<compile_context>
chip_gen: v5e
topology: v5e:2x2
jax: 0.10.0
libtpu: 0.0.40
codegen_flags: <defaults>
</compile_context>

<pallas_src>
import functools

import jax
import jax.numpy as jnp
from jax.experimental import pallas as pl
from jax.experimental.pallas import tpu as pltpu

HIDDEN = 100       # fixed by the module definition
HIDDEN_PAD = 128   # HIDDEN padded to one full lane tile
LANE = 128
TB = 256           # batch columns (lanes) per grid step


def _round_up(x, m):
    return (x + m - 1) // m * m


def _contextnet_kernel(x_ref, w1_ref, b1_ref, w23t_ref, b23_ref, w4_ref, b4_ref,
                       out_ref, *, L):
    """One batch tile (batch on lanes): x_ref (L, TB) f32 -> out_ref (1, TB) f32."""
    x = x_ref[...]                                   # (L, TB) lane-dense rows
    hp = w1_ref.shape[0]
    tb = x.shape[1]

    # Hoisted lane-broadcasts of the layer-1 column constants (once per grid step,
    # NOT once per l -- JAX does not CSE broadcast_in_dim).
    w1_b = jnp.broadcast_to(w1_ref[...], (hp, tb))   # (Hp, TB)
    b1_b = jnp.broadcast_to(b1_ref[...], (hp, tb))   # (Hp, TB)

    # ---- Layer 1 (Linear(1,100)+ReLU) with the L-sum hoisted above layer 2:
    #        s[h, b] = sum_l ReLU(w1[h] * x[l, b] + b1[h])
    # Each l: sublane broadcast of a lane-dense row + VPU FMA/ReLU/accumulate.
    s = jnp.zeros((hp, tb), jnp.float32)
    if L <= 16:
        for l in range(L):                           # small static L: full unroll
            s = s + jnp.maximum(x[l:l + 1, :] * w1_b + b1_b, 0.0)
    else:
        # Larger L: bounded live ranges via a partially unrolled fori_loop.
        def body(l, acc):
            xl = jax.lax.dynamic_slice_in_dim(x, l, 1, axis=0)   # (1, TB)
            return acc + jnp.maximum(xl * w1_b + b1_b, 0.0)
        s = jax.lax.fori_loop(0, L, body, s, unroll=4)

    # ---- Fused layers 2+3 (exact: no activation between them), one MXU matmul:
    #   h3 = ReLU(W23^T @ s + b23),  W23 = w2@w3,  b23 = L*(b2@w3)+b3 (pre-folded).
    h3 = jnp.dot(w23t_ref[...], s, preferred_element_type=jnp.float32)
    h3 = jnp.maximum(h3 + b23_ref[...], 0.0)         # (Hp, TB); (Hp,1) lane-bcast add

    # ---- Layer 4 + Sigmoid: one (1,Hp)@(Hp,TB) MXU row -> lane-dense output row.
    z = jnp.dot(w4_ref[...], h3, preferred_element_type=jnp.float32) + b4_ref[0]
    out_ref[...] = 1.0 / (1.0 + jnp.exp(-z))         # exact sigmoid; exp on the EUP


def contextnet_forward(x, params):
    """x: (B, L) float32.  Returns (B, 1) float32 (matches the PyTorch Net)."""
    w1, b1, w2, b2, w3, b3, w4, b4 = params
    B, L = x.shape
    Hp = HIDDEN_PAD
    f32 = jnp.float32
    hi = jax.lax.Precision.HIGHEST

    # --- Wrapper-side constant folding (done once, reused across all grid steps) ---
    w23 = jnp.dot(w2.astype(f32), w3.astype(f32), precision=hi)                    # (H, H)
    b23 = float(L) * jnp.dot(b2.astype(f32), w3.astype(f32), precision=hi) \
        + b3.astype(f32)                                                           # (1, H)

    def pad2(a, rows, cols):
        r, c = a.shape
        return jnp.pad(a.astype(f32), ((0, rows - r), (0, cols - c)))

    w1_col = pad2(w1.T, Hp, 1)                  # (Hp, 1)  layer-1 weight as a column
    b1_col = pad2(b1.T, Hp, 1)                  # (Hp, 1)
    w23t = pad2(w23.T, Hp, Hp)                  # (Hp, Hp) fused (w2@w3)^T
    b23_col = pad2(b23.T, Hp, 1)                # (Hp, 1)  fused bias (L-scale folded in)
    w4_row = pad2(w4.T, 1, Hp)                  # (1, Hp)
    b4s = b4.reshape(-1)[:1].astype(f32)        # (1,) scalar -> SMEM

    # Batch-on-lanes: x enters transposed as (L, B_pad).  Keep the grid-step count
    # even when >1 so the batch-parallel axis shards across both v7x TensorCores.
    steps = -(-B // TB)
    if steps > 1:
        steps = _round_up(steps, 2)
    B_pad = steps * TB
    x_t = jnp.pad(x.astype(f32).T, ((0, 0), (0, B_pad - B)))   # (L, B_pad)

    const = lambda i: (0, 0)   # constant index map: weights stay VMEM-resident

    out = pl.pallas_call(
        functools.partial(_contextnet_kernel, L=L),
        out_shape=jax.ShapeDtypeStruct((1, B_pad), jnp.float32),
        grid=(steps,),
        in_specs=[
            pl.BlockSpec((L, TB), lambda i: (0, i)),            # x^T: tiled over batch lanes
            pl.BlockSpec((Hp, 1), const),                       # w1 column
            pl.BlockSpec((Hp, 1), const),                       # b1 column
            pl.BlockSpec((Hp, Hp), const),                      # fused (w2@w3)^T
            pl.BlockSpec((Hp, 1), const),                       # fused bias column
            pl.BlockSpec((1, Hp), const),                       # w4 row
            pl.BlockSpec(memory_space=pltpu.MemorySpace.SMEM),  # b4 scalar
        ],
        out_specs=pl.BlockSpec((1, TB), lambda i: (0, i)),      # lane-dense output row
        compiler_params=pltpu.CompilerParams(
            dimension_semantics=("parallel",),     # batch axis -> 2 TCs on v7x
            vmem_limit_bytes=32 * 1024 * 1024,
        ),
    )(x_t, w1_col, b1_col, w23t, b23_col, w4_row, b4s)

    return out[0, :B].reshape(B, 1)


def init_params(key, n_inputs):
    """Deterministic init mimicking PyTorch's default Linear init (U[-1/sqrt(fan_in), +])."""
    def linear(key, fan_in, fan_out):
        kw, kb = jax.random.split(key)
        bound = 1.0 / jnp.sqrt(float(fan_in))
        w = jax.random.uniform(kw, (fan_in, fan_out), jnp.float32, -bound, bound)
        b = jax.random.uniform(kb, (1, fan_out), jnp.float32, -bound, bound)
        return w, b

    k1, k2, k3, k4 = jax.random.split(key, 4)
    w1, b1 = linear(k1, 1, HIDDEN)          # Linear(1, 100)
    w2, b2 = linear(k2, HIDDEN, n_inputs)   # Linear(100, n_inputs)
    w3, b3 = linear(k3, n_inputs, HIDDEN)   # Linear(n_inputs, 100)
    w4, b4 = linear(k4, HIDDEN, 1)          # Linear(100, 1)
    return (w1, b1, w2, b2, w3, b3, w4, b4)


def reference_forward(x, params):
    """Pure-JAX reference mirroring the PyTorch forward (un-padded, un-fused)."""
    w1, b1, w2, b2, w3, b3, w4, b4 = params
    h = jnp.maximum(x[..., None] @ w1 + b1, 0.0)          # (B, L, 100)
    latent = (h @ w2 + b2).sum(axis=1)                    # (B, n_inputs)
    h3 = jnp.maximum(latent @ w3 + b3[0], 0.0)            # (B, 100)
    return jax.nn.sigmoid(h3 @ w4 + b4[0])                # (B, 1)


if __name__ == "__main__":
    B, L, n_inputs = 2, 8, 32
    key = jax.random.PRNGKey(0)
    kx, kp = jax.random.split(key)

    x = jax.random.normal(kx, (B, L), jnp.float32)
    params = init_params(kp, n_inputs)

    out = contextnet_forward(x, params)
    out = jax.block_until_ready(out)

    ref = reference_forward(x, params)
    assert out.shape == (B, 1)
    assert jnp.allclose(out, ref, atol=1e-5, rtol=1e-4), (out, ref)
    print("KERNEL_OK")
</pallas_src>

<mosaic_0001>
module attributes {stable_mosaic.version = 11 : i64} {
  func.func @_contextnet_kernel(%arg0: i32, %arg1: memref<8x256xf32, #tpu.memory_space<vmem>>, %arg2: memref<128x1xf32, #tpu.memory_space<vmem>>, %arg3: memref<128x1xf32, #tpu.memory_space<vmem>>, %arg4: memref<128x128xf32, #tpu.memory_space<vmem>>, %arg5: memref<128x1xf32, #tpu.memory_space<vmem>>, %arg6: memref<1x128xf32, #tpu.memory_space<vmem>>, %arg7: memref<1xf32, #tpu.memory_space<smem>>, %arg8: memref<1x256xf32, #tpu.memory_space<vmem>>) attributes {dimension_semantics = [#tpu.dimension_semantics<parallel>], iteration_bounds = array<i64: 1>, scalar_prefetch = 0 : i64, scratch_operands = 0 : i64, tpu.core_type = #tpu.core_type<tc>, window_params = [{transform_indices = @transform_0, window_bounds = array<i64: 8, 256>}, {pipeline_mode = #tpu.pipeline_mode<synchronous>, transform_indices = @transform_1, window_bounds = array<i64: 128, 1>}, {pipeline_mode = #tpu.pipeline_mode<synchronous>, transform_indices = @transform_2, window_bounds = array<i64: 128, 1>}, {pipeline_mode = #tpu.pipeline_mode<synchronous>, transform_indices = @transform_3, window_bounds = array<i64: 128, 128>}, {pipeline_mode = #tpu.pipeline_mode<synchronous>, transform_indices = @transform_4, window_bounds = array<i64: 128, 1>}, {pipeline_mode = #tpu.pipeline_mode<synchronous>, transform_indices = @transform_5, window_bounds = array<i64: 1, 128>}, {transform_indices = @transform_6, window_bounds = array<i64: 1>}, {transform_indices = @transform_7, window_bounds = array<i64: 1, 256>}]} {
    %c0 = arith.constant 0 : index
    %c0_0 = arith.constant 0 : index
    %0 = vector.load %arg1[%c0, %c0_0] : memref<8x256xf32, #tpu.memory_space<vmem>>, vector<8x256xf32>
    %c0_1 = arith.constant 0 : index
    %c0_2 = arith.constant 0 : index
    %1 = vector.load %arg2[%c0_1, %c0_2] : memref<128x1xf32, #tpu.memory_space<vmem>>, vector<128x1xf32>
    %2 = vector.shape_cast %1 : vector<128x1xf32> to vector<128x1xf32>
    %3 = vector.broadcast %2 : vector<128x1xf32> to vector<128x256xf32>
    %c0_3 = arith.constant 0 : index
    %c0_4 = arith.constant 0 : index
    %4 = vector.load %arg3[%c0_3, %c0_4] : memref<128x1xf32, #tpu.memory_space<vmem>>, vector<128x1xf32>
    %5 = vector.shape_cast %4 : vector<128x1xf32> to vector<128x1xf32>
    %6 = vector.broadcast %5 : vector<128x1xf32> to vector<128x256xf32>
    %cst = arith.constant 0.000000e+00 : f32
    %7 = vector.broadcast %cst : f32 to vector<128x256xf32>
    %8 = vector.extract_strided_slice %0 {offsets = [0, 0], sizes = [1, 256], strides = [1, 1]} : vector<8x256xf32> to vector<1x256xf32>
    %9 = vector.broadcast %8 : vector<1x256xf32> to vector<128x256xf32>
    %10 = arith.mulf %9, %3 : vector<128x256xf32>
    %11 = arith.addf %10, %6 : vector<128x256xf32>
    %cst_5 = arith.constant 0.000000e+00 : f32
    %12 = vector.broadcast %cst_5 : f32 to vector<128x256xf32>
    %13 = arith.maximumf %11, %12 : vector<128x256xf32>
    %14 = arith.addf %7, %13 : vector<128x256xf32>
    %15 = vector.extract_strided_slice %0 {offsets = [1, 0], sizes = [1, 256], strides = [1, 1]} : vector<8x256xf32> to vector<1x256xf32>
    %16 = vector.broadcast %15 : vector<1x256xf32> to vector<128x256xf32>
    %17 = arith.mulf %16, %3 : vector<128x256xf32>
    %18 = arith.addf %17, %6 : vector<128x256xf32>
    %cst_6 = arith.constant 0.000000e+00 : f32
    %19 = vector.broadcast %cst_6 : f32 to vector<128x256xf32>
    %20 = arith.maximumf %18, %19 : vector<128x256xf32>
    %21 = arith.addf %14, %20 : vector<128x256xf32>
    %22 = vector.extract_strided_slice %0 {offsets = [2, 0], sizes = [1, 256], strides = [1, 1]} : vector<8x256xf32> to vector<1x256xf32>
    %23 = vector.broadcast %22 : vector<1x256xf32> to vector<128x256xf32>
    %24 = arith.mulf %23, %3 : vector<128x256xf32>
    %25 = arith.addf %24, %6 : vector<128x256xf32>
    %cst_7 = arith.constant 0.000000e+00 : f32
    %26 = vector.broadcast %cst_7 : f32 to vector<128x256xf32>
    %27 = arith.maximumf %25, %26 : vector<128x256xf32>
    %28 = arith.addf %21, %27 : vector<128x256xf32>
    %29 = vector.extract_strided_slice %0 {offsets = [3, 0], sizes = [1, 256], strides = [1, 1]} : vector<8x256xf32> to vector<1x256xf32>
    %30 = vector.broadcast %29 : vector<1x256xf32> to vector<128x256xf32>
    %31 = arith.mulf %30, %3 : vector<128x256xf32>
    %32 = arith.addf %31, %6 : vector<128x256xf32>
    %cst_8 = arith.constant 0.000000e+00 : f32
    %33 = vector.broadcast %cst_8 : f32 to vector<128x256xf32>
    %34 = arith.maximumf %32, %33 : vector<128x256xf32>
    %35 = arith.addf %28, %34 : vector<128x256xf32>
    %36 = vector.extract_strided_slice %0 {offsets = [4, 0], sizes = [1, 256], strides = [1, 1]} : vector<8x256xf32> to vector<1x256xf32>
    %37 = vector.broadcast %36 : vector<1x256xf32> to vector<128x256xf32>
    %38 = arith.mulf %37, %3 : vector<128x256xf32>
    %39 = arith.addf %38, %6 : vector<128x256xf32>
    %cst_9 = arith.constant 0.000000e+00 : f32
    %40 = vector.broadcast %cst_9 : f32 to vector<128x256xf32>
    %41 = arith.maximumf %39, %40 : vector<128x256xf32>
    %42 = arith.addf %35, %41 : vector<128x256xf32>
    %43 = vector.extract_strided_slice %0 {offsets = [5, 0], sizes = [1, 256], strides = [1, 1]} : vector<8x256xf32> to vector<1x256xf32>
    %44 = vector.broadcast %43 : vector<1x256xf32> to vector<128x256xf32>
    %45 = arith.mulf %44, %3 : vector<128x256xf32>
    %46 = arith.addf %45, %6 : vector<128x256xf32>
    %cst_10 = arith.constant 0.000000e+00 : f32
    %47 = vector.broadcast %cst_10 : f32 to vector<128x256xf32>
    %48 = arith.maximumf %46, %47 : vector<128x256xf32>
    %49 = arith.addf %42, %48 : vector<128x256xf32>
    %50 = vector.extract_strided_slice %0 {offsets = [6, 0], sizes = [1, 256], strides = [1, 1]} : vector<8x256xf32> to vector<1x256xf32>
    %51 = vector.broadcast %50 : vector<1x256xf32> to vector<128x256xf32>
    %52 = arith.mulf %51, %3 : vector<128x256xf32>
    %53 = arith.addf %52, %6 : vector<128x256xf32>
    %cst_11 = arith.constant 0.000000e+00 : f32
    %54 = vector.broadcast %cst_11 : f32 to vector<128x256xf32>
    %55 = arith.maximumf %53, %54 : vector<128x256xf32>
    %56 = arith.addf %49, %55 : vector<128x256xf32>
    %57 = vector.extract_strided_slice %0 {offsets = [7, 0], sizes = [1, 256], strides = [1, 1]} : vector<8x256xf32> to vector<1x256xf32>
    %58 = vector.broadcast %57 : vector<1x256xf32> to vector<128x256xf32>
    %59 = arith.mulf %58, %3 : vector<128x256xf32>
    %60 = arith.addf %59, %6 : vector<128x256xf32>
    %cst_12 = arith.constant 0.000000e+00 : f32
    %61 = vector.broadcast %cst_12 : f32 to vector<128x256xf32>
    %62 = arith.maximumf %60, %61 : vector<128x256xf32>
    %63 = arith.addf %56, %62 : vector<128x256xf32>
    %c0_13 = arith.constant 0 : index
    %c0_14 = arith.constant 0 : index
    %64 = vector.load %arg4[%c0_13, %c0_14] : memref<128x128xf32, #tpu.memory_space<vmem>>, vector<128x128xf32>
    %cst_15 = arith.constant dense<0.000000e+00> : vector<128x256xf32>
    %65 = tpu.matmul %64, %63, %cst_15 {dimension_numbers = #tpu.dot_dimension_numbers<[1], [0], [0], [1], [0, 0, 1, 1], [], []>} : vector<128x128xf32>, vector<128x256xf32>, vector<128x256xf32> -> vector<128x256xf32>
    %c0_16 = arith.constant 0 : index
    %c0_17 = arith.constant 0 : index
    %66 = vector.load %arg5[%c0_16, %c0_17] : memref<128x1xf32, #tpu.memory_space<vmem>>, vector<128x1xf32>
    %67 = vector.broadcast %66 : vector<128x1xf32> to vector<128x256xf32>
    %68 = arith.addf %65, %67 : vector<128x256xf32>
    %cst_18 = arith.constant 0.000000e+00 : f32
    %69 = vector.broadcast %cst_18 : f32 to vector<128x256xf32>
    %70 = arith.maximumf %68, %69 : vector<128x256xf32>
    %c0_19 = arith.constant 0 : index
    %c0_20 = arith.constant 0 : index
    %71 = vector.load %arg6[%c0_19, %c0_20] : memref<1x128xf32, #tpu.memory_space<vmem>>, vector<1x128xf32>
    %cst_21 = arith.constant dense<0.000000e+00> : vector<1x256xf32>
    %72 = tpu.matmul %71, %70, %cst_21 {dimension_numbers = #tpu.dot_dimension_numbers<[1], [0], [0], [1], [0, 0, 1, 1], [], []>} : vector<1x128xf32>, vector<128x256xf32>, vector<1x256xf32> -> vector<1x256xf32>
    %c0_22 = arith.constant 0 : index
    %73 = memref.load %arg7[%c0_22] : memref<1xf32, #tpu.memory_space<smem>>
    %74 = vector.broadcast %73 : f32 to vector<1x256xf32>
    %75 = arith.addf %72, %74 : vector<1x256xf32>
    %cst_23 = arith.constant 0.000000e+00 : f32
    %76 = vector.broadcast %cst_23 : f32 to vector<1x256xf32>
    %77 = arith.subf %76, %75 : vector<1x256xf32>
    %78 = math.exp %77 : vector<1x256xf32>
    %cst_24 = arith.constant 1.000000e+00 : f32
    %79 = vector.broadcast %cst_24 : f32 to vector<1x256xf32>
    %80 = arith.addf %79, %78 : vector<1x256xf32>
    %cst_25 = arith.constant 1.000000e+00 : f32
    %81 = vector.broadcast %cst_25 : f32 to vector<1x256xf32>
    %82 = arith.divf %81, %80 : vector<1x256xf32>
    %c0_26 = arith.constant 0 : index
    %c0_27 = arith.constant 0 : index
    %83 = vector.load %arg8[%c0_26, %c0_27] : memref<1x256xf32, #tpu.memory_space<vmem>>, vector<1x256xf32>
    tpu.vector_store %arg8[%c0_26, %c0_27], %82 {strides = array<i32>} : memref<1x256xf32, #tpu.memory_space<vmem>>, vector<1x256xf32>,
    return
  }
  func.func @transform_0(%arg0: i32) -> (i32, i32) {
    %c0_i32 = arith.constant 0 : i32
    %c0_i32_0 = arith.constant 0 : i32
    return %c0_i32, %arg0 : i32, i32
  }
  func.func @transform_1(%arg0: i32) -> (i32, i32) {
    %c0_i32 = arith.constant 0 : i32
    %c0_i32_0 = arith.constant 0 : i32
    %c0_i32_1 = arith.constant 0 : i32
    return %c0_i32, %c0_i32_0 : i32, i32
  }
  func.func @transform_2(%arg0: i32) -> (i32, i32) {
    %c0_i32 = arith.constant 0 : i32
    %c0_i32_0 = arith.constant 0 : i32
    %c0_i32_1 = arith.constant 0 : i32
    return %c0_i32, %c0_i32_0 : i32, i32
  }
  func.func @transform_3(%arg0: i32) -> (i32, i32) {
    %c0_i32 = arith.constant 0 : i32
    %c0_i32_0 = arith.constant 0 : i32
    %c0_i32_1 = arith.constant 0 : i32
    return %c0_i32, %c0_i32_0 : i32, i32
  }
  func.func @transform_4(%arg0: i32) -> (i32, i32) {
    %c0_i32 = arith.constant 0 : i32
    %c0_i32_0 = arith.constant 0 : i32
    %c0_i32_1 = arith.constant 0 : i32
    return %c0_i32, %c0_i32_0 : i32, i32
  }
  func.func @transform_5(%arg0: i32) -> (i32, i32) {
    %c0_i32 = arith.constant 0 : i32
    %c0_i32_0 = arith.constant 0 : i32
    %c0_i32_1 = arith.constant 0 : i32
    return %c0_i32, %c0_i32_0 : i32, i32
  }
  func.func @transform_6(%arg0: i32) -> i32 {
    %c0_i32 = arith.constant 0 : i32
    %c0_i32_0 = arith.constant 0 : i32
    return %c0_i32 : i32
  }
  func.func @transform_7(%arg0: i32) -> (i32, i32) {
    %c0_i32 = arith.constant 0 : i32
    %c0_i32_0 = arith.constant 0 : i32
    return %c0_i32, %arg0 : i32, i32
  }
}

</mosaic_0001>

<bundles_post_ra>
// kernel: tpu_custom_call.1
= control target key start
LH: loop header
LB: loop body
LE: loop exit
PB: predicated region body
PF: predicated region fallthrough
CT: control target
= control target key end

     0   :  { %v1715_v3 = vmov 0   ;;  %s2869_s0 = inlined_call_operand.vmem [shape: f32[8,256], index: 0, kind: input, shape index: {}]   ;;  %s2870_s1 = inlined_call_operand.vmem [shape: f32[128,1], index: 1, kind: input, shape index: {}]   ;;  %s2871_s2 = inlined_call_operand.vmem [shape: f32[128,1], index: 2, kind: input, shape index: {}]   ;;  %s2872_s3 = inlined_call_operand.vmem [shape: f32[128,128], index: 3, kind: input, shape index: {}]   ;;  %s2873_s4 = inlined_call_operand.vmem [shape: f32[128,1], index: 4, kind: input, shape index: {}]   ;;  %s2874_s5 = inlined_call_operand.vmem [shape: f32[1,128], index: 5, kind: input, shape index: {}]   ;;  %s2875_s6 = inlined_call_operand.<no memory space> [shape: f32[1], index: 6, kind: input, shape index: {}]   ;;  %s2876_s7 = inlined_call_operand.hbm [shape: f32[1,256], index: 7, kind: output, shape index: {}]  }
   0x1   :  { %v140_v0 = vld [vmem:[%s2871_s2 + $0x70] sm:$0xff]  ;;  %v141_v1 = vld [vmem:[%s2871_s2 + $0x78] sm:$0xff]  ;;  %1680 = vset.pattern.permute.xlu2 %v1715_v3  ;;  %1679 = vset.pattern.permute.xlu1 %v1715_v3 }
   0x2   :  { %v45_v2 = vld [vmem:[%s2870_s1 + $0x78] sm:$0xff]  ;;  %1678 = vset.pattern.permute.xlu0 %v1715_v3  ;;  %214 = vperm.xlu2 %1680, %v140_v0  }
   0x3   :  { %219 = vperm.xlu1 %1679, %v141_v1   ;;  %123 = vperm.xlu0 %1678, %v45_v2  }
   0x4   :  { %13 = vsyncpa [#allocation4], 0  ;;  %v42_v4 = vld [vmem:[%s2870_s1 + $0x60] sm:$0xff]  ;;  %v44_v5 = vld [vmem:[%s2870_s1 + $0x70] sm:$0xff]  ;;  %s1635_s13 = sshll.u32 %s2876_s7, 4  ;;  %vm1620_vm7 = vcmask 1040384   ;;  %s1636_s13 = int_to_ptr.hbm [resolvable:$true] %s1635_s13 }
   0x5   :  { %v43_v6 = vld [vmem:[%s2870_s1 + $0x68] sm:$0xff]  ;;  %v138_v7 = vld [vmem:[%s2871_s2 + $0x60] sm:$0xff]  ;;  %v41_v9 = vld [vmem:[%s2870_s1 + $0x58] sm:$0xff] }
   0x6   :  { %v139_v8 = vld [vmem:[%s2871_s2 + $0x68] sm:$0xff]  ;;  %v137_v11 = vld [vmem:[%s2871_s2 + $0x58] sm:$0xff]  ;;  %v40_v12 = vld [vmem:[%s2870_s1 + $0x50] sm:$0xff] }
   0x7   :  { %v39_v10 = vld [vmem:[%s2870_s1 + $0x48] sm:$0xff]  ;;  %v136_v14 = vld [vmem:[%s2871_s2 + $0x50] sm:$0xff]  ;;  %v38_v15 = vld [vmem:[%s2870_s1 + $0x40] sm:$0xff] }
   0x8   :  { %v135_v13 = vld [vmem:[%s2871_s2 + $0x48] sm:$0xff]  ;;  %v36_v16 = vld [vmem:[%s2870_s1 + $0x30] sm:$0xff]  ;;  %v134_v17 = vld [vmem:[%s2871_s2 + $0x40] sm:$0xff] }
   0x9   :  { %v37_v18 = vld [vmem:[%s2870_s1 + $0x38] sm:$0xff]  ;;  %v132_v19 = vld [vmem:[%s2871_s2 + $0x30] sm:$0xff]  ;;  %v35_v21 = vld [vmem:[%s2870_s1 + $0x28] sm:$0xff] }
   0xa   :  { %108 = vperm.xlu2 %1680, %v42_v4   ;;  %v133_v20 = vld [vmem:[%s2871_s2 + $0x38] sm:$0xff]  ;;  %v131_v23 = vld [vmem:[%s2871_s2 + $0x28] sm:$0xff]  ;;  %v34_v24 = vld [vmem:[%s2870_s1 + $0x20] sm:$0xff] }
   0xb   :  { %118 = vperm.xlu0 %1678, %v44_v5   ;;  %113 = vperm.xlu1 %1679, %v43_v6   ;;  %v33_v22 = vld [vmem:[%s2870_s1 + $0x18] sm:$0xff]  ;;  %v130_v26 = vld [vmem:[%s2871_s2 + $0x20] sm:$0xff]  ;;  %v32_v27 = vld [vmem:[%s2870_s1 + $0x10] sm:$0xff] }
   0xc   :  { %v129_v25 = vld [vmem:[%s2871_s2 + $0x18] sm:$0xff]  ;;  %v30_v28 = vld [vmem:[%s2870_s1] sm:$0xff]  ;;  %v128_v29 = vld [vmem:[%s2871_s2 + $0x10] sm:$0xff] }
   0xd   :  { %v31_v30 = vld [vmem:[%s2870_s1 + $0x8] sm:$0xff]  ;;  %v1293_v31 = vld [vmem:[%s2873_s4 + $0x78] sm:$0xff]  ;;  %v126_v32 = vld [vmem:[%s2871_s2] sm:$0xff] }
   0xe   :  { %v127_v33 = vld [vmem:[%s2871_s2 + $0x8] sm:$0xff]  ;;  %v1290_v34 = vld [vmem:[%s2873_s4 + $0x60] sm:$0xff]  ;;  %v1292_v36 = vld [vmem:[%s2873_s4 + $0x70] sm:$0xff] }
   0xf   :  { %v1291_v35 = vld [vmem:[%s2873_s4 + $0x68] sm:$0xff]  ;;  %v1288_v39 = vld [vmem:[%s2873_s4 + $0x50] sm:$0xff]  ;;  %v1289_v40 = vld [vmem:[%s2873_s4 + $0x58] sm:$0xff] }
  0x10   :  { %v1287_v37 = vld [vmem:[%s2873_s4 + $0x48] sm:$0xff]  ;;  %v1284_v41 = vld [vmem:[%s2873_s4 + $0x30] sm:$0xff]  ;;  %v1285_v42 = vld [vmem:[%s2873_s4 + $0x38] sm:$0xff] }
  0x11   :  { %v1286_v43 = vld [vmem:[%s2873_s4 + $0x40] sm:$0xff]  ;;  %v29_v47 = vld [vmem:[%s2869_s0 + $0x8] sm:$0xff]  ;;  %v1281_v48 = vld [vmem:[%s2873_s4 + $0x18] sm:$0xff] }
  0x12   :  { %204 = vperm.xlu2 %1680, %v138_v7   ;;  %v28_v45 = vld [vmem:[%s2869_s0] sm:$0xff]  ;;  %v1283_v50 = vld [vmem:[%s2873_s4 + $0x28] sm:$0xff]  ;;  %v1906_v52 = vperm.slane %v29_v47, 0  ;;  %v1922_v60 = vperm.slane %v29_v47, 1  ;;  %v1926_v62 = vperm.slane %v29_v47, 2  ;;  %v1928_v63 = vperm.slane %v29_v47, 3 }
  0x13   :  { %209 = vperm.xlu0 %1678, %v139_v8   ;;  %103 = vperm.xlu1 %1679, %v41_v9   ;;  %v1890_v46 = vperm.slane %v28_v45, 0  ;;  %v1282_v49 = vld [vmem:[%s2873_s4 + $0x20] sm:$0xff]  ;;  %v1904_v51 = vperm.slane %v28_v45, 1  ;;  %v1908_v53 = vperm.slane %v28_v45, 2  ;;  %v1910_v54 = vperm.slane %v28_v45, 3 }
  0x14   :  { %v1912_v55 = vperm.slane %v28_v45, 4  ;;  %v1916_v57 = vperm.slane %v28_v45, 5  ;;  %v1918_v58 = vperm.slane %v28_v45, 6  ;;  %v1920_v59 = vperm.slane %v28_v45, 7 }
  0x15   :  { %v1930_v0 = vperm.slane %v29_v47, 4  ;;  %v1932_v1 = vperm.slane %v29_v47, 5  ;;  %v1936_v3 = vperm.slane %v29_v47, 6  ;;  %v1938_v4 = vperm.slane %v29_v47, 7 }
  0x1a   :  { %93 = vperm.xlu2 %1680, %v39_v10  }
  0x1b   :  { %199 = vperm.xlu1 %1679, %v137_v11   ;;  %98 = vperm.xlu0 %1678, %v40_v12   ;;  %v1278_v12 = vld [vmem:[%s2873_s4] sm:$0xff] }
  0x22   :  { %189 = vperm.xlu2 %1680, %v135_v13  }
  0x23   :  { %194 = vperm.xlu0 %1678, %v136_v14   ;;  %88 = vperm.xlu1 %1679, %v38_v15  }
  0x2a   :  { %78 = vperm.xlu2 %1680, %v36_v16  }
  0x2b   :  { %184 = vperm.xlu1 %1679, %v134_v17   ;;  %83 = vperm.xlu0 %1678, %v37_v18   ;;  %v1279_v17 = vld [vmem:[%s2873_s4 + $0x8] sm:$0xff]  ;;  %v1280_v18 = vld [vmem:[%s2873_s4 + $0x10] sm:$0xff] }
  0x32   :  { %174 = vperm.xlu2 %1680, %v132_v19  }
  0x33   :  { %179 = vperm.xlu0 %1678, %v133_v20   ;;  %73 = vperm.xlu1 %1679, %v35_v21  }
  0x3a   :  { %63 = vperm.xlu2 %1680, %v33_v22  }
  0x3b   :  { %169 = vperm.xlu1 %1679, %v131_v23   ;;  %68 = vperm.xlu0 %1678, %v34_v24  }
  0x42   :  { %159 = vperm.xlu2 %1680, %v129_v25  }
  0x43   :  { %164 = vperm.xlu0 %1678, %v130_v26   ;;  %58 = vperm.xlu1 %1679, %v32_v27  }
  0x4a   :  { %48 = vperm.xlu2 %1680, %v30_v28  }
  0x4b   :  { %154 = vperm.xlu1 %1679, %v128_v29   ;;  %53 = vperm.xlu0 %1678, %v31_v30  }
  0x52   :  { %1371 = vperm.xlu2 %1680, %v1293_v31  }
  0x53   :  { %144 = vperm.xlu1 %1679, %v126_v32   ;;  %149 = vperm.xlu0 %1678, %v127_v33  }
  0x5a   :  { %1356 = vperm.xlu2 %1680, %v1290_v34  }
  0x5b   :  { %1361 = vperm.xlu1 %1679, %v1291_v35   ;;  %1366 = vperm.xlu0 %1678, %v1292_v36  }
  0x5c   :  { %v1868_v38 = vpop.permute.xlu2 %214 }
  0x62   :  { %1341 = vperm.xlu2 %1680, %v1287_v37  }
  0x63   :  { %1346 = vperm.xlu1 %1679, %v1288_v39   ;;  %1351 = vperm.xlu0 %1678, %v1289_v40  }
  0x64   :  { %v1885_v44 = vpop.permute.xlu2 %108 }
  0x65   :  { %v248_v56 = vmul.f32 %v1890_v46, %v1885_v44  ;;  %v378_v6 = vmul.f32 %v1904_v51, %v1885_v44 }
  0x6a   :  { %1326 = vperm.xlu2 %1680, %v1284_v41  }
  0x6b   :  { %1331 = vperm.xlu1 %1679, %v1285_v42   ;;  %1336 = vperm.xlu0 %1678, %v1286_v43  }
  0x6c   :  { %v1924_v61 = vpop.permute.xlu2 %204 }
  0x6d   :  { %v1941_v5 = vadd.f32 %v248_v56, %v1924_v61  ;;  %v1971_v26 = vadd.f32 %v378_v6, %v1924_v61 }
  0x72   :  { %1311 = vperm.xlu2 %1680, %v1281_v48  }
  0x73   :  { %1316 = vperm.xlu1 %1679, %v1282_v49   ;;  %1321 = vperm.xlu0 %1678, %v1283_v50  }
  0x75   :  { %v1934_v2 = vpop.permute.xlu0 %123  ;;  %v220_v11 = vpop.permute.xlu1 %219 }
  0x76   :  { %v254_v7 = vmul.f32 %v1890_v46, %v1934_v2  ;;  %v384_v8 = vmul.f32 %v1904_v51, %v1934_v2  ;;  %v514_v9 = vmul.f32 %v1908_v53, %v1934_v2  ;;  %v644_v10 = vmul.f32 %v1910_v54, %v1934_v2 }
  0x77   :  { %v774_v13 = vmul.f32 %v1912_v55, %v1934_v2  ;;  %v904_v14 = vmul.f32 %v1916_v57, %v1934_v2  ;;  %v1034_v15 = vmul.f32 %v1918_v58, %v1934_v2  ;;  %v1164_v16 = vmul.f32 %v1920_v59, %v1934_v2 }
  0x78   :  { %v286_v19 = vadd.f32 %v254_v7, %v220_v11  ;;  %v416_v20 = vadd.f32 %v384_v8, %v220_v11  ;;  %v546_v21 = vadd.f32 %v514_v9, %v220_v11  ;;  %v676_v22 = vadd.f32 %v644_v10, %v220_v11 }
  0x79   :  { %v806_v23 = vadd.f32 %v774_v13, %v220_v11  ;;  %v936_v24 = vadd.f32 %v904_v14, %v220_v11  ;;  %v1066_v25 = vadd.f32 %v1034_v15, %v220_v11  ;;  %v1196_v30 = vadd.f32 %v1164_v16, %v220_v11 }
  0x7a   :  { %1296 = vperm.xlu2 %1680, %v1278_v12   ;;  %v318_v27 = vmax.f32 %v286_v19, 0.0  ;;  %v448_v28 = vmax.f32 %v416_v20, 0.0  ;;  %v578_v29 = vmax.f32 %v546_v21, 0.0  ;;  %v708_v31 = vmax.f32 %v676_v22, 0.0 }
  0x7b   :  { %1301 = vperm.xlu1 %1679, %v1279_v17   ;;  %1306 = vperm.xlu0 %1678, %v1280_v18   ;;  %v838_v32 = vmax.f32 %v806_v23, 0.0  ;;  %v968_v33 = vmax.f32 %v936_v24, 0.0  ;;  %v1098_v34 = vmax.f32 %v1066_v25, 0.0  ;;  %v255_v36 = vmul.f32 %v1906_v52, %v1934_v2 }
  0x7c   :  { %v480_v35 = vadd.f32 %v448_v28, %v318_v27  ;;  %v385_v37 = vmul.f32 %v1922_v60, %v1934_v2  ;;  %v515_v39 = vmul.f32 %v1926_v62, %v1934_v2  ;;  %v645_v40 = vmul.f32 %v1928_v63, %v1934_v2 }
  0x7d   :  { %v775_v41 = vmul.f32 %v1930_v0, %v1934_v2  ;;  %v905_v42 = vmul.f32 %v1932_v1, %v1934_v2  ;;  %v1035_v43 = vmul.f32 %v1936_v3, %v1934_v2  ;;  %v287_v47 = vadd.f32 %v255_v36, %v220_v11  ;;  %v1987_v50 = vpop.permute.xlu0 %118 }
  0x7e   :  { %v610_v45 = vadd.f32 %v578_v29, %v480_v35  ;;  %v417_v48 = vadd.f32 %v385_v37, %v220_v11  ;;  %v547_v49 = vadd.f32 %v515_v39, %v220_v11  ;;  %v1228_v56 = vmax.f32 %v1196_v30, 0.0 }
  0x7f   :  { %v677_v6 = vadd.f32 %v645_v40, %v220_v11  ;;  %v807_v7 = vadd.f32 %v775_v41, %v220_v11  ;;  %v937_v8 = vadd.f32 %v905_v42, %v220_v11  ;;  %v319_v10 = vmax.f32 %v287_v47, 0.0 }
  0x80   :  { %v740_v9 = vadd.f32 %v708_v31, %v610_v45  ;;  %v449_v12 = vmax.f32 %v417_v48, 0.0  ;;  %v1067_v13 = vadd.f32 %v1035_v43, %v220_v11  ;;  %v579_v14 = vmax.f32 %v547_v49, 0.0 }
  0x81   :  { %v709_v15 = vmax.f32 %v677_v6, 0.0  ;;  %v839_v16 = vmax.f32 %v807_v7, 0.0  ;;  %v969_v17 = vmax.f32 %v937_v8, 0.0  ;;  %v1165_v20 = vmul.f32 %v1938_v4, %v1934_v2 }
  0x82   :  { %v870_v18 = vadd.f32 %v838_v32, %v740_v9  ;;  %v481_v19 = vadd.f32 %v449_v12, %v319_v10  ;;  %v252_v21 = vmul.f32 %v1890_v46, %v1987_v50  ;;  %v382_v22 = vmul.f32 %v1904_v51, %v1987_v50 }
  0x83   :  { %v512_v23 = vmul.f32 %v1908_v53, %v1987_v50  ;;  %v642_v24 = vmul.f32 %v1910_v54, %v1987_v50  ;;  %v772_v25 = vmul.f32 %v1912_v55, %v1987_v50  ;;  %v1197_v29 = vadd.f32 %v1165_v20, %v220_v11 }
  0x84   :  { %v1000_v27 = vadd.f32 %v968_v33, %v870_v18  ;;  %v611_v28 = vadd.f32 %v579_v14, %v481_v19  ;;  %v284_v2 = vadd.f32 %v252_v21, %v1868_v38  ;;  %v1099_v30 = vmax.f32 %v1067_v13, 0.0 }
  0x85   :  { %v414_v31 = vadd.f32 %v382_v22, %v1868_v38  ;;  %v544_v32 = vadd.f32 %v512_v23, %v1868_v38  ;;  %v674_v35 = vadd.f32 %v642_v24, %v1868_v38  ;;  %v804_v40 = vadd.f32 %v772_v25, %v1868_v38  ;;  %v2024_v24 = vpop.permute.xlu1 %113 }
  0x86   :  { %v1130_v36 = vadd.f32 %v1098_v34, %v1000_v27  ;;  %v741_v37 = vadd.f32 %v709_v15, %v611_v28  ;;  %v316_v39 = vmax.f32 %v284_v2, 0.0  ;;  %v1229_v41 = vmax.f32 %v1197_v29, 0.0 }
  0x87   :  { %v446_v42 = vmax.f32 %v414_v31, 0.0  ;;  %v576_v43 = vmax.f32 %v544_v32, 0.0  ;;  %v706_v33 = vmax.f32 %v674_v35, 0.0  ;;  %v902_v47 = vmul.f32 %v1916_v57, %v1987_v50  ;;  %v2035_v35 = vpop.permute.xlu0 %209 }
  0x88   :  { %v1260_v45 = vadd.f32 %v1228_v56, %v1130_v36  ;;  %v871_v11 = vadd.f32 %v839_v16, %v741_v37  ;;  %v1032_v48 = vmul.f32 %v1918_v58, %v1987_v50  ;;  %v1162_v34 = vmul.f32 %v1920_v59, %v1987_v50 }
  0x89   :  { %v478_v49 = vadd.f32 %v446_v42, %v316_v39  ;;  %v253_v6 = vmul.f32 %v1906_v52, %v1987_v50  ;;  %v383_v7 = vmul.f32 %v1922_v60, %v1987_v50  ;;  %v836_v8 = vmax.f32 %v804_v40, 0.0 }
  0x8a   :  { %1374 = vmatpush.msra.mxu0 %v1260_v45  ;;  %1644 = vmatpush.msra.mxu2 %v1260_v45  ;;  %v1001_v56 = vadd.f32 %v969_v17, %v871_v11  ;;  %v934_v9 = vadd.f32 %v902_v47, %v1868_v38  ;;  %v1064_v10 = vadd.f32 %v1032_v48, %v1868_v38  ;;  %v312_v15 = vmax.f32 %v1941_v5, 0.0 }
  0x8b   :  { %v608_v12 = vadd.f32 %v576_v43, %v478_v49  ;;  %v285_v13 = vadd.f32 %v253_v6, %v1868_v38  ;;  %v415_v14 = vadd.f32 %v383_v7, %v1868_v38  ;;  %v1194_v19 = vadd.f32 %v1162_v34, %v1868_v38 }
  0x8c   :  { %v1131_v16 = vadd.f32 %v1099_v30, %v1001_v56  ;;  %v966_v18 = vmax.f32 %v934_v9, 0.0  ;;  %v513_v20 = vmul.f32 %v1926_v62, %v1987_v50  ;;  %v1096_v21 = vmax.f32 %v1064_v10, 0.0 }
  0x8d   :  { %v738_v17 = vadd.f32 %v706_v33, %v608_v12  ;;  %v317_v22 = vmax.f32 %v285_v13, 0.0  ;;  %v447_v23 = vmax.f32 %v415_v14, 0.0  ;;  %v643_v28 = vmul.f32 %v1928_v63, %v1987_v50 }
  0x8e   :  { %v1261_v25 = vadd.f32 %v1229_v41, %v1131_v16  ;;  %v545_v27 = vadd.f32 %v513_v20, %v1868_v38  ;;  %v773_v29 = vmul.f32 %v1930_v0, %v1987_v50  ;;  %v903_v31 = vmul.f32 %v1932_v1, %v1987_v50 }
  0x8f   :  { %v868_v2 = vadd.f32 %v836_v8, %v738_v17  ;;  %v479_v30 = vadd.f32 %v447_v23, %v317_v22  ;;  %v1033_v32 = vmul.f32 %v1936_v3, %v1987_v50  ;;  %v675_v37 = vadd.f32 %v643_v28, %v1868_v38 }
  0x90   :  { %1439 = vmatpush.msra.mxu1 %v1261_v25  ;;  %1660 = vmatpush.msra.mxu3 %v1261_v25  ;;  %v577_v36 = vmax.f32 %v545_v27, 0.0  ;;  %v805_v39 = vadd.f32 %v773_v29, %v1868_v38  ;;  %v1163_v40 = vmul.f32 %v1938_v4, %v1987_v50  ;;  %v935_v42 = vadd.f32 %v903_v31, %v1868_v38 }
  0x91   :  { %v998_v41 = vadd.f32 %v966_v18, %v868_v2  ;;  %v1065_v43 = vadd.f32 %v1033_v32, %v1868_v38  ;;  %v250_v33 = vmul.f32 %v1890_v46, %v2024_v24  ;;  %v1226_v45 = vmax.f32 %v1194_v19, 0.0 }
  0x92   :  { %v609_v11 = vadd.f32 %v577_v36, %v479_v30  ;;  %v707_v47 = vmax.f32 %v675_v37, 0.0  ;;  %v837_v48 = vmax.f32 %v805_v39, 0.0  ;;  %v967_v34 = vmax.f32 %v935_v42, 0.0 }
  0x93   :  { %v1128_v49 = vadd.f32 %v1096_v21, %v998_v41  ;;  %v1195_v6 = vadd.f32 %v1163_v40, %v1868_v38  ;;  %v282_v7 = vadd.f32 %v250_v33, %v2035_v35  ;;  %v1097_v50 = vmax.f32 %v1065_v43, 0.0 }
  0x94   :  { %v739_v56 = vadd.f32 %v707_v47, %v609_v11  ;;  %v380_v8 = vmul.f32 %v1904_v51, %v2024_v24  ;;  %v510_v9 = vmul.f32 %v1908_v53, %v2024_v24  ;;  %v640_v13 = vmul.f32 %v1910_v54, %v2024_v24 }
  0x95   :  { %v1258_v10 = vadd.f32 %v1226_v45, %v1128_v49  ;;  %v314_v12 = vmax.f32 %v282_v7, 0.0  ;;  %v770_v14 = vmul.f32 %v1912_v55, %v2024_v24  ;;  %v900_v19 = vmul.f32 %v1916_v57, %v2024_v24 }
  0x96   :  { %v869_v16 = vadd.f32 %v837_v48, %v739_v56  ;;  %v412_v38 = vadd.f32 %v380_v8, %v2035_v35  ;;  %v542_v18 = vadd.f32 %v510_v9, %v2035_v35  ;;  %v1227_v20 = vmax.f32 %v1195_v6, 0.0 }
  0x97   :  { %1375 = vmatpush.msra.mxu0 %v1258_v10  ;;  %1645 = vmatpush.msra.mxu2 %v1258_v10  ;;  %v672_v17 = vadd.f32 %v640_v13, %v2035_v35  ;;  %v802_v21 = vadd.f32 %v770_v14, %v2035_v35  ;;  %v1030_v22 = vmul.f32 %v1918_v58, %v2024_v24  ;;  %v442_v28 = vmax.f32 %v1971_v26, 0.0 }
  0x98   :  { %v999_v23 = vadd.f32 %v967_v34, %v869_v16  ;;  %v444_v25 = vmax.f32 %v412_v38, 0.0  ;;  %v932_v27 = vadd.f32 %v900_v19, %v2035_v35  ;;  %v574_v29 = vmax.f32 %v542_v18, 0.0 }
  0x99   :  { %v704_v2 = vmax.f32 %v672_v17, 0.0  ;;  %v1062_v30 = vadd.f32 %v1030_v22, %v2035_v35  ;;  %v1160_v31 = vmul.f32 %v1920_v59, %v2024_v24  ;;  %v834_v37 = vmax.f32 %v802_v21, 0.0 }
  0x9a   :  { %v1129_v32 = vadd.f32 %v1097_v50, %v999_v23  ;;  %v476_v36 = vadd.f32 %v444_v25, %v314_v12  ;;  %v251_v39 = vmul.f32 %v1906_v52, %v2024_v24  ;;  %v964_v40 = vmax.f32 %v932_v27, 0.0 }
  0x9b   :  { %v1192_v41 = vadd.f32 %v1160_v31, %v2035_v35  ;;  %v381_v42 = vmul.f32 %v1922_v60, %v2024_v24  ;;  %v511_v26 = vmul.f32 %v1926_v62, %v2024_v24  ;;  %v641_v11 = vmul.f32 %v1928_v63, %v2024_v24  ;;  %v2101_v31 = vpop.permute.xlu1 %103 }
  0x9c   :  { %v1259_v43 = vadd.f32 %v1227_v20, %v1129_v32  ;;  %v606_v33 = vadd.f32 %v574_v29, %v476_v36  ;;  %v283_v45 = vadd.f32 %v251_v39, %v2035_v35  ;;  %v1094_v47 = vmax.f32 %v1062_v30, 0.0 }
  0x9d   :  { %v413_v48 = vadd.f32 %v381_v42, %v2035_v35  ;;  %v543_v49 = vadd.f32 %v511_v26, %v2035_v35  ;;  %v771_v34 = vmul.f32 %v1930_v0, %v2024_v24  ;;  %v673_v56 = vadd.f32 %v641_v11, %v2035_v35 }
  0x9e   :  { %1440 = vmatpush.msra.mxu1 %v1259_v43  ;;  %1661 = vmatpush.msra.mxu3 %v1259_v43  ;;  %v736_v6 = vadd.f32 %v704_v2, %v606_v33  ;;  %v315_v7 = vmax.f32 %v283_v45, 0.0  ;;  %v901_v50 = vmul.f32 %v1932_v1, %v2024_v24  ;;  %v1224_v8 = vmax.f32 %v1192_v41, 0.0 }
  0x9f   :  { %v445_v9 = vmax.f32 %v413_v48, 0.0  ;;  %v803_v10 = vadd.f32 %v771_v34, %v2035_v35  ;;  %v1031_v12 = vmul.f32 %v1936_v3, %v2024_v24  ;;  %v575_v14 = vmax.f32 %v543_v49, 0.0 }
  0xa0   :  { %v866_v13 = vadd.f32 %v834_v37, %v736_v6  ;;  %v705_v16 = vmax.f32 %v673_v56, 0.0  ;;  %v933_v38 = vadd.f32 %v901_v50, %v2035_v35  ;;  %v1161_v17 = vmul.f32 %v1938_v4, %v2024_v24 }
  0xa1   :  { %v477_v18 = vadd.f32 %v445_v9, %v315_v7  ;;  %v835_v19 = vmax.f32 %v803_v10, 0.0  ;;  %v1063_v20 = vadd.f32 %v1031_v12, %v2035_v35  ;;  %v474_v23 = vadd.f32 %v442_v28, %v312_v15 }
  0xa2   :  { %v996_v21 = vadd.f32 %v964_v40, %v866_v13  ;;  %v965_v22 = vmax.f32 %v933_v38, 0.0  ;;  %v508_v25 = vmul.f32 %v1908_v53, %v1885_v44  ;;  %v1193_v29 = vadd.f32 %v1161_v17, %v2035_v35 }
  0xa3   :  { %v607_v27 = vadd.f32 %v575_v14, %v477_v18  ;;  %v638_v2 = vmul.f32 %v1910_v54, %v1885_v44  ;;  %v768_v30 = vmul.f32 %v1912_v55, %v1885_v44  ;;  %v1095_v32 = vmax.f32 %v1063_v20, 0.0 }
  0xa4   :  { %v1126_v24 = vadd.f32 %v1094_v47, %v996_v21  ;;  %v540_v36 = vadd.f32 %v508_v25, %v1924_v61  ;;  %v898_v5 = vmul.f32 %v1916_v57, %v1885_v44  ;;  %v1028_v37 = vmul.f32 %v1918_v58, %v1885_v44  ;;  %v2132_v25 = vpop.permute.xlu1 %199 }
  0xa5   :  { %v737_v15 = vadd.f32 %v705_v16, %v607_v27  ;;  %v670_v28 = vadd.f32 %v638_v2, %v1924_v61  ;;  %v800_v35 = vadd.f32 %v768_v30, %v1924_v61  ;;  %v1158_v42 = vmul.f32 %v1920_v59, %v1885_v44 }
  0xa6   :  { %v1256_v39 = vadd.f32 %v1224_v8, %v1126_v24  ;;  %v572_v40 = vmax.f32 %v540_v36, 0.0  ;;  %v930_v41 = vadd.f32 %v898_v5, %v1924_v61  ;;  %v1225_v43 = vmax.f32 %v1193_v29, 0.0 }
  0xa7   :  { %v867_v26 = vadd.f32 %v835_v19, %v737_v15  ;;  %v702_v33 = vmax.f32 %v670_v28, 0.0  ;;  %v1060_v45 = vadd.f32 %v1028_v37, %v1924_v61  ;;  %v832_v47 = vmax.f32 %v800_v35, 0.0 }
  0xa8   :  { %1376 = vmatpush.msra.mxu0 %v1256_v39  ;;  %1646 = vmatpush.msra.mxu2 %v1256_v39  ;;  %v604_v11 = vadd.f32 %v572_v40, %v474_v23  ;;  %v962_v48 = vmax.f32 %v930_v41, 0.0  ;;  %v249_v49 = vmul.f32 %v1906_v52, %v1885_v44  ;;  %v1190_v6 = vadd.f32 %v1158_v42, %v1924_v61 }
  0xa9   :  { %v997_v34 = vadd.f32 %v965_v22, %v867_v26  ;;  %v379_v7 = vmul.f32 %v1922_v60, %v1885_v44  ;;  %v509_v56 = vmul.f32 %v1926_v62, %v1885_v44  ;;  %v1092_v8 = vmax.f32 %v1060_v45, 0.0 }
  0xaa   :  { %v734_v50 = vadd.f32 %v702_v33, %v604_v11  ;;  %v281_v9 = vadd.f32 %v249_v49, %v1924_v61  ;;  %v639_v10 = vmul.f32 %v1928_v63, %v1885_v44  ;;  %v769_v16 = vmul.f32 %v1930_v0, %v1885_v44 }
  0xab   :  { %v1127_v12 = vadd.f32 %v1095_v32, %v997_v34  ;;  %v411_v13 = vadd.f32 %v379_v7, %v1924_v61  ;;  %v541_v14 = vadd.f32 %v509_v56, %v1924_v61  ;;  %v899_v20 = vmul.f32 %v1932_v1, %v1885_v44  ;;  %v2157_v7 = vpop.permute.xlu0 %98 }
  0xac   :  { %v864_v38 = vadd.f32 %v832_v47, %v734_v50  ;;  %v313_v18 = vmax.f32 %v281_v9, 0.0  ;;  %v671_v19 = vadd.f32 %v639_v10, %v1924_v61  ;;  %v801_v23 = vadd.f32 %v769_v16, %v1924_v61 }
  0xad   :  { %v1257_v17 = vadd.f32 %v1225_v43, %v1127_v12  ;;  %v443_v21 = vmax.f32 %v411_v13, 0.0  ;;  %v573_v22 = vmax.f32 %v541_v14, 0.0  ;;  %v1222_v29 = vmax.f32 %v1190_v6, 0.0 }
  0xae   :  { %v994_v27 = vadd.f32 %v962_v48, %v864_v38  ;;  %v931_v2 = vadd.f32 %v899_v20, %v1924_v61  ;;  %v1029_v30 = vmul.f32 %v1936_v3, %v1885_v44  ;;  %v703_v32 = vmax.f32 %v671_v19, 0.0 }
  0xaf   :  { %1441 = vmatpush.msra.mxu1 %v1257_v17  ;;  %1662 = vmatpush.msra.mxu3 %v1257_v17  ;;  %v475_v24 = vadd.f32 %v443_v21, %v313_v18  ;;  %v1159_v36 = vmul.f32 %v1938_v4, %v1885_v44  ;;  %v246_v5 = vmul.f32 %v1890_v46, %v2101_v31  ;;  %v833_v28 = vmax.f32 %v801_v23, 0.0 }
  0xb0   :  { %v1124_v15 = vadd.f32 %v1092_v8, %v994_v27  ;;  %v376_v35 = vmul.f32 %v1904_v51, %v2101_v31  ;;  %v1061_v39 = vadd.f32 %v1029_v30, %v1924_v61  ;;  %v506_v41 = vmul.f32 %v1908_v53, %v2101_v31 }
  0xb1   :  { %v605_v37 = vadd.f32 %v573_v22, %v475_v24  ;;  %v278_v40 = vadd.f32 %v246_v5, %v2132_v25  ;;  %v963_v26 = vmax.f32 %v931_v2, 0.0  ;;  %v636_v43 = vmul.f32 %v1910_v54, %v2101_v31 }
  0xb2   :  { %v1254_v42 = vadd.f32 %v1222_v29, %v1124_v15  ;;  %v408_v44 = vadd.f32 %v376_v35, %v2132_v25  ;;  %v1191_v45 = vadd.f32 %v1159_v36, %v1924_v61  ;;  %v538_v47 = vadd.f32 %v506_v41, %v2132_v25 }
  0xb3   :  { %v735_v33 = vadd.f32 %v703_v32, %v605_v37  ;;  %v310_v11 = vmax.f32 %v278_v40, 0.0  ;;  %v668_v49 = vadd.f32 %v636_v43, %v2132_v25  ;;  %v766_v34 = vmul.f32 %v1912_v55, %v2101_v31 }
  0xb4   :  { %1377 = vmatpush.msra.mxu0 %v1254_v42  ;;  %1647 = vmatpush.msra.mxu2 %v1254_v42  ;;  %v440_v48 = vmax.f32 %v408_v44, 0.0  ;;  %v896_v6 = vmul.f32 %v1916_v57, %v2101_v31  ;;  %v1093_v50 = vmax.f32 %v1061_v39, 0.0  ;;  %v570_v8 = vmax.f32 %v538_v47, 0.0 }
  0xb5   :  { %v865_v56 = vadd.f32 %v833_v28, %v735_v33  ;;  %v1026_v61 = vmul.f32 %v1918_v58, %v2101_v31  ;;  %v798_v10 = vadd.f32 %v766_v34, %v2132_v25  ;;  %v1156_v13 = vmul.f32 %v1920_v59, %v2101_v31 }
  0xb6   :  { %v472_v9 = vadd.f32 %v440_v48, %v310_v11  ;;  %v928_v12 = vadd.f32 %v896_v6, %v2132_v25  ;;  %v1223_v16 = vmax.f32 %v1191_v45, 0.0  ;;  %v700_v38 = vmax.f32 %v668_v49, 0.0  ;;  %v2185_v11 = vpop.permute.xlu0 %194 }
  0xb7   :  { %v995_v14 = vadd.f32 %v963_v26, %v865_v56  ;;  %v247_v18 = vmul.f32 %v1906_v52, %v2101_v31  ;;  %v1058_v20 = vadd.f32 %v1026_v61, %v2132_v25  ;;  %v1188_v17 = vadd.f32 %v1156_v13, %v2132_v25 }
  0xb8   :  { %v602_v19 = vadd.f32 %v570_v8, %v472_v9  ;;  %v377_v21 = vmul.f32 %v1922_v60, %v2101_v31  ;;  %v830_v23 = vmax.f32 %v798_v10, 0.0  ;;  %v960_v27 = vmax.f32 %v928_v12, 0.0 }
  0xb9   :  { %v1125_v22 = vadd.f32 %v1093_v50, %v995_v14  ;;  %v279_v29 = vadd.f32 %v247_v18, %v2132_v25  ;;  %v507_v24 = vmul.f32 %v1926_v62, %v2101_v31  ;;  %v637_v32 = vmul.f32 %v1928_v63, %v2101_v31 }
  0xba   :  { %v732_v2 = vadd.f32 %v700_v38, %v602_v19  ;;  %v409_v30 = vadd.f32 %v377_v21, %v2132_v25  ;;  %v767_v15 = vmul.f32 %v1930_v0, %v2101_v31  ;;  %v897_v28 = vmul.f32 %v1932_v1, %v2101_v31 }
  0xbb   :  { %v1255_v36 = vadd.f32 %v1223_v16, %v1125_v22  ;;  %v311_v5 = vmax.f32 %v279_v29, 0.0  ;;  %v539_v39 = vadd.f32 %v507_v24, %v2132_v25  ;;  %v669_v40 = vadd.f32 %v637_v32, %v2132_v25 }
  0xbc   :  { %v862_v35 = vadd.f32 %v830_v23, %v732_v2  ;;  %v441_v37 = vmax.f32 %v409_v30, 0.0  ;;  %v1090_v41 = vmax.f32 %v1058_v20, 0.0  ;;  %v1220_v42 = vmax.f32 %v1188_v17, 0.0 }
  0xbd   :  { %1442 = vmatpush.msra.mxu1 %v1255_v36  ;;  %1663 = vmatpush.msra.mxu3 %v1255_v36  ;;  %v799_v26 = vadd.f32 %v767_v15, %v2132_v25  ;;  %v571_v33 = vmax.f32 %v539_v39, 0.0  ;;  %v929_v45 = vadd.f32 %v897_v28, %v2132_v25  ;;  %v701_v47 = vmax.f32 %v669_v40, 0.0 }
  0xbe   :  { %v992_v44 = vadd.f32 %v960_v27, %v862_v35  ;;  %v473_v43 = vadd.f32 %v441_v37, %v311_v5  ;;  %v1027_v49 = vmul.f32 %v1936_v3, %v2101_v31  ;;  %v1157_v34 = vmul.f32 %v1938_v4, %v2101_v31 }
  0xbf   :  { %v831_v48 = vmax.f32 %v799_v26, 0.0  ;;  %v244_v50 = vmul.f32 %v1890_v46, %v2157_v7  ;;  %v374_v8 = vmul.f32 %v1904_v51, %v2157_v7  ;;  %v504_v10 = vmul.f32 %v1908_v53, %v2157_v7 }
  0xc0   :  { %v1122_v6 = vadd.f32 %v1090_v41, %v992_v44  ;;  %v603_v56 = vadd.f32 %v571_v33, %v473_v43  ;;  %v1059_v61 = vadd.f32 %v1027_v49, %v2132_v25  ;;  %v1189_v9 = vadd.f32 %v1157_v34, %v2132_v25  ;;  %v2207_v25 = vpop.permute.xlu2 %93 }
  0xc1   :  { %v634_v12 = vmul.f32 %v1910_v54, %v2157_v7  ;;  %v276_v14 = vadd.f32 %v244_v50, %v2185_v11  ;;  %v406_v16 = vadd.f32 %v374_v8, %v2185_v11  ;;  %v536_v38 = vadd.f32 %v504_v10, %v2185_v11 }
  0xc2   :  { %v1252_v13 = vadd.f32 %v1220_v42, %v1122_v6  ;;  %v733_v31 = vadd.f32 %v701_v47, %v603_v56  ;;  %v764_v19 = vmul.f32 %v1912_v55, %v2157_v7  ;;  %v961_v17 = vmax.f32 %v929_v45, 0.0 }
  0xc3   :  { %v666_v18 = vadd.f32 %v634_v12, %v2185_v11  ;;  %v308_v21 = vmax.f32 %v276_v14, 0.0  ;;  %v438_v22 = vmax.f32 %v406_v16, 0.0  ;;  %v1091_v23 = vmax.f32 %v1059_v61, 0.0 }
  0xc4   :  { %1378 = vmatpush.msra.mxu0 %v1252_v13  ;;  %1648 = vmatpush.msra.mxu2 %v1252_v13  ;;  %v863_v20 = vadd.f32 %v831_v48, %v733_v31  ;;  %v1221_v27 = vmax.f32 %v1189_v9, 0.0  ;;  %v796_v29 = vadd.f32 %v764_v19, %v2185_v11  ;;  %v894_v2 = vmul.f32 %v1916_v57, %v2157_v7 }
  0xc5   :  { %v470_v24 = vadd.f32 %v438_v22, %v308_v21  ;;  %v568_v32 = vmax.f32 %v536_v38, 0.0  ;;  %v698_v36 = vmax.f32 %v666_v18, 0.0  ;;  %v1024_v15 = vmul.f32 %v1918_v58, %v2157_v7 }
  0xc6   :  { %v993_v30 = vadd.f32 %v961_v17, %v863_v20  ;;  %v926_v5 = vadd.f32 %v894_v2, %v2185_v11  ;;  %v245_v28 = vmul.f32 %v1906_v52, %v2157_v7  ;;  %v375_v35 = vmul.f32 %v1922_v60, %v2157_v7 }
  0xc7   :  { %v600_v39 = vadd.f32 %v568_v32, %v470_v24  ;;  %v828_v40 = vmax.f32 %v796_v29, 0.0  ;;  %v1154_v41 = vmul.f32 %v1920_v59, %v2157_v7  ;;  %v1056_v42 = vadd.f32 %v1024_v15, %v2185_v11 }
  0xc8   :  { %v1123_v37 = vadd.f32 %v1091_v23, %v993_v30  ;;  %v277_v26 = vadd.f32 %v245_v28, %v2185_v11  ;;  %v407_v44 = vadd.f32 %v375_v35, %v2185_v11  ;;  %v505_v43 = vmul.f32 %v1926_v62, %v2157_v7  ;;  %v2236_v14 = vpop.permute.xlu2 %189 }
  0xc9   :  { %v730_v45 = vadd.f32 %v698_v36, %v600_v39  ;;  %v1186_v47 = vadd.f32 %v1154_v41, %v2185_v11  ;;  %v635_v48 = vmul.f32 %v1928_v63, %v2157_v7  ;;  %v765_v56 = vmul.f32 %v1930_v0, %v2157_v7  ;;  %v2258_v41 = vpop.permute.xlu1 %88 }
  0xca   :  { %v1253_v33 = vadd.f32 %v1221_v27, %v1123_v37  ;;  %v309_v49 = vmax.f32 %v277_v26, 0.0  ;;  %v439_v34 = vmax.f32 %v407_v44, 0.0  ;;  %v537_v6 = vadd.f32 %v505_v43, %v2185_v11 }
  0xcb   :  { %v860_v50 = vadd.f32 %v828_v40, %v730_v45  ;;  %v958_v8 = vmax.f32 %v926_v5, 0.0  ;;  %v667_v61 = vadd.f32 %v635_v48, %v2185_v11  ;;  %v895_v9 = vmul.f32 %v1932_v1, %v2157_v7 }
  0xcc   :  { %1443 = vmatpush.msra.mxu1 %v1253_v33  ;;  %1664 = vmatpush.msra.mxu3 %v1253_v33  ;;  %v1088_v10 = vmax.f32 %v1056_v42, 0.0  ;;  %v471_v12 = vadd.f32 %v439_v34, %v309_v49  ;;  %v569_v13 = vmax.f32 %v537_v6, 0.0  ;;  %v797_v31 = vadd.f32 %v765_v56, %v2185_v11 }
  0xcd   :  { %v990_v16 = vadd.f32 %v958_v8, %v860_v50  ;;  %v1218_v38 = vmax.f32 %v1186_v47, 0.0  ;;  %v927_v18 = vadd.f32 %v895_v9, %v2185_v11  ;;  %v1025_v19 = vmul.f32 %v1936_v3, %v2157_v7 }
  0xce   :  { %v601_v20 = vadd.f32 %v569_v13, %v471_v12  ;;  %v699_v17 = vmax.f32 %v667_v61, 0.0  ;;  %v1155_v21 = vmul.f32 %v1938_v4, %v2157_v7  ;;  %v242_v22 = vmul.f32 %v1890_v46, %v2207_v25 }
  0xcf   :  { %v1120_v23 = vadd.f32 %v1088_v10, %v990_v16  ;;  %v829_v27 = vmax.f32 %v797_v31, 0.0  ;;  %v1057_v29 = vadd.f32 %v1025_v19, %v2185_v11  ;;  %v372_v2 = vmul.f32 %v1904_v51, %v2207_v25 }
  0xd0   :  { %v731_v30 = vadd.f32 %v699_v17, %v601_v20  ;;  %v959_v24 = vmax.f32 %v927_v18, 0.0  ;;  %v274_v32 = vadd.f32 %v242_v22, %v2236_v14  ;;  %v502_v36 = vmul.f32 %v1908_v53, %v2207_v25 }
  0xd1   :  { %v1250_v5 = vadd.f32 %v1218_v38, %v1120_v23  ;;  %v1187_v7 = vadd.f32 %v1155_v21, %v2185_v11  ;;  %v404_v15 = vadd.f32 %v372_v2, %v2236_v14  ;;  %v632_v28 = vmul.f32 %v1910_v54, %v2207_v25 }
  0xd2   :  { %v861_v35 = vadd.f32 %v829_v27, %v731_v30  ;;  %v306_v37 = vmax.f32 %v274_v32, 0.0  ;;  %v534_v39 = vadd.f32 %v502_v36, %v2236_v14  ;;  %v762_v40 = vmul.f32 %v1912_v55, %v2207_v25 }
  0xd3   :  { %1379 = vmatpush.msra.mxu0 %v1250_v5  ;;  %1649 = vmatpush.msra.mxu2 %v1250_v5  ;;  %v436_v42 = vmax.f32 %v404_v15, 0.0  ;;  %v664_v26 = vadd.f32 %v632_v28, %v2236_v14  ;;  %v892_v11 = vmul.f32 %v1916_v57, %v2207_v25  ;;  %v1022_v44 = vmul.f32 %v1918_v58, %v2207_v25  ;;  %v2292_v15 = vpop.permute.xlu1 %184 }
  0xd4   :  { %v991_v43 = vadd.f32 %v959_v24, %v861_v35  ;;  %v1089_v33 = vmax.f32 %v1057_v29, 0.0  ;;  %v794_v45 = vadd.f32 %v762_v40, %v2236_v14  ;;  %v1152_v47 = vmul.f32 %v1920_v59, %v2207_v25 }
  0xd5   :  { %v1219_v48 = vmax.f32 %v1187_v7, 0.0  ;;  %v468_v49 = vadd.f32 %v436_v42, %v306_v37  ;;  %v566_v34 = vmax.f32 %v534_v39, 0.0  ;;  %v696_v56 = vmax.f32 %v664_v26, 0.0 }
  0xd6   :  { %v1121_v6 = vadd.f32 %v1089_v33, %v991_v43  ;;  %v924_v50 = vadd.f32 %v892_v11, %v2236_v14  ;;  %v243_v8 = vmul.f32 %v1906_v52, %v2207_v25  ;;  %v826_v9 = vmax.f32 %v794_v45, 0.0 }
  0xd7   :  { %v598_v61 = vadd.f32 %v566_v34, %v468_v49  ;;  %v1054_v10 = vadd.f32 %v1022_v44, %v2236_v14  ;;  %v373_v12 = vmul.f32 %v1922_v60, %v2207_v25  ;;  %v1184_v31 = vadd.f32 %v1152_v47, %v2236_v14 }
  0xd8   :  { %v1251_v13 = vadd.f32 %v1219_v48, %v1121_v6  ;;  %v275_v16 = vadd.f32 %v243_v8, %v2236_v14  ;;  %v503_v38 = vmul.f32 %v1926_v62, %v2207_v25  ;;  %v633_v20 = vmul.f32 %v1928_v63, %v2207_v25 }
  0xd9   :  { %v728_v18 = vadd.f32 %v696_v56, %v598_v61  ;;  %v405_v19 = vadd.f32 %v373_v12, %v2236_v14  ;;  %v763_v17 = vmul.f32 %v1930_v0, %v2207_v25  ;;  %v893_v23 = vmul.f32 %v1932_v1, %v2207_v25 }
  0xda   :  { %1444 = vmatpush.msra.mxu1 %v1251_v13  ;;  %1665 = vmatpush.msra.mxu3 %v1251_v13  ;;  %v307_v21 = vmax.f32 %v275_v16, 0.0  ;;  %v535_v22 = vadd.f32 %v503_v38, %v2236_v14  ;;  %v1023_v27 = vmul.f32 %v1936_v3, %v2207_v25  ;;  %v956_v2 = vmax.f32 %v924_v50, 0.0  ;;  %v2310_v50 = vpop.permute.xlu0 %83 }
  0xdb   :  { %v858_v29 = vadd.f32 %v826_v9, %v728_v18  ;;  %v437_v30 = vmax.f32 %v405_v19, 0.0  ;;  %v665_v24 = vadd.f32 %v633_v20, %v2236_v14  ;;  %v1086_v32 = vmax.f32 %v1054_v10, 0.0 }
  0xdc   :  { %v1216_v36 = vmax.f32 %v1184_v31, 0.0  ;;  %v795_v5 = vadd.f32 %v763_v17, %v2236_v14  ;;  %v1153_v7 = vmul.f32 %v1938_v4, %v2207_v25  ;;  %v567_v37 = vmax.f32 %v535_v22, 0.0 }
  0xdd   :  { %v988_v28 = vadd.f32 %v956_v2, %v858_v29  ;;  %v469_v35 = vadd.f32 %v437_v30, %v307_v21  ;;  %v925_v39 = vadd.f32 %v893_v23, %v2236_v14  ;;  %v697_v40 = vmax.f32 %v665_v24, 0.0 }
  0xde   :  { %v1055_v42 = vadd.f32 %v1023_v27, %v2236_v14  ;;  %v1185_v26 = vadd.f32 %v1153_v7, %v2236_v14  ;;  %v240_v11 = vmul.f32 %v1890_v46, %v2258_v41  ;;  %v370_v25 = vmul.f32 %v1904_v51, %v2258_v41 }
  0xdf   :  { %v1118_v44 = vadd.f32 %v1086_v32, %v988_v28  ;;  %v599_v43 = vadd.f32 %v567_v37, %v469_v35  ;;  %v500_v33 = vmul.f32 %v1908_v53, %v2258_v41  ;;  %v827_v45 = vmax.f32 %v795_v5, 0.0 }
  0xe0   :  { %v272_v47 = vadd.f32 %v240_v11, %v2292_v15  ;;  %v630_v48 = vmul.f32 %v1910_v54, %v2258_v41  ;;  %v760_v14 = vmul.f32 %v1912_v55, %v2258_v41  ;;  %v402_v6 = vadd.f32 %v370_v25, %v2292_v15 }
  0xe1   :  { %v1248_v49 = vadd.f32 %v1216_v36, %v1118_v44  ;;  %v729_v34 = vadd.f32 %v697_v40, %v599_v43  ;;  %v532_v56 = vadd.f32 %v500_v33, %v2292_v15  ;;  %v957_v8 = vmax.f32 %v925_v39, 0.0 }
  0xe2   :  { %v1087_v61 = vmax.f32 %v1055_v42, 0.0  ;;  %v304_v9 = vmax.f32 %v272_v47, 0.0  ;;  %v662_v10 = vadd.f32 %v630_v48, %v2292_v15  ;;  %v1217_v13 = vmax.f32 %v1185_v26, 0.0  ;;  %v2337_v48 = vpop.permute.xlu0 %179 }
  0xe3   :  { %1380 = vmatpush.msra.mxu0 %v1248_v49  ;;  %1650 = vmatpush.msra.mxu2 %v1248_v49  ;;  %v859_v12 = vadd.f32 %v827_v45, %v729_v34  ;;  %v434_v31 = vmax.f32 %v402_v6, 0.0  ;;  %v792_v16 = vadd.f32 %v760_v14, %v2292_v15  ;;  %v564_v38 = vmax.f32 %v532_v56, 0.0 }
  0xe4   :  { %v694_v18 = vmax.f32 %v662_v10, 0.0  ;;  %v890_v19 = vmul.f32 %v1916_v57, %v2258_v41  ;;  %v1020_v20 = vmul.f32 %v1918_v58, %v2258_v41  ;;  %v1150_v22 = vmul.f32 %v1920_v59, %v2258_v41 }
  0xe5   :  { %v989_v17 = vadd.f32 %v957_v8, %v859_v12  ;;  %v466_v21 = vadd.f32 %v434_v31, %v304_v9  ;;  %v241_v23 = vmul.f32 %v1906_v52, %v2258_v41  ;;  %v371_v2 = vmul.f32 %v1922_v60, %v2258_v41 }
  0xe6   :  { %v922_v27 = vadd.f32 %v890_v19, %v2292_v15  ;;  %v1052_v29 = vadd.f32 %v1020_v20, %v2292_v15  ;;  %v501_v30 = vmul.f32 %v1926_v62, %v2258_v41  ;;  %v1182_v36 = vadd.f32 %v1150_v22, %v2292_v15 }
  0xe7   :  { %v1119_v24 = vadd.f32 %v1087_v61, %v989_v17  ;;  %v596_v32 = vadd.f32 %v564_v38, %v466_v21  ;;  %v273_v5 = vadd.f32 %v241_v23, %v2292_v15  ;;  %v403_v7 = vadd.f32 %v371_v2, %v2292_v15 }
  0xe8   :  { %v533_v28 = vadd.f32 %v501_v30, %v2292_v15  ;;  %v631_v35 = vmul.f32 %v1928_v63, %v2258_v41  ;;  %v824_v40 = vmax.f32 %v792_v16, 0.0  ;;  %v954_v26 = vmax.f32 %v922_v27, 0.0 }
  0xe9   :  { %v1249_v37 = vadd.f32 %v1217_v13, %v1119_v24  ;;  %v726_v39 = vadd.f32 %v694_v18, %v596_v32  ;;  %v305_v42 = vmax.f32 %v273_v5, 0.0  ;;  %v435_v11 = vmax.f32 %v403_v7, 0.0 }
  0xea   :  { %v663_v44 = vadd.f32 %v631_v35, %v2292_v15  ;;  %v761_v43 = vmul.f32 %v1930_v0, %v2258_v41  ;;  %v1084_v33 = vmax.f32 %v1052_v29, 0.0  ;;  %v1214_v45 = vmax.f32 %v1182_v36, 0.0 }
  0xeb   :  { %1445 = vmatpush.msra.mxu1 %v1249_v37  ;;  %1666 = vmatpush.msra.mxu3 %v1249_v37  ;;  %v856_v25 = vadd.f32 %v824_v40, %v726_v39  ;;  %v565_v47 = vmax.f32 %v533_v28, 0.0  ;;  %v467_v14 = vadd.f32 %v435_v11, %v305_v42  ;;  %v891_v34 = vmul.f32 %v1932_v1, %v2258_v41 }
  0xec   :  { %v793_v49 = vadd.f32 %v761_v43, %v2292_v15  ;;  %v1021_v6 = vmul.f32 %v1936_v3, %v2258_v41  ;;  %v695_v8 = vmax.f32 %v663_v44, 0.0  ;;  %v1151_v61 = vmul.f32 %v1938_v4, %v2258_v41 }
  0xed   :  { %v986_v56 = vadd.f32 %v954_v26, %v856_v25  ;;  %v238_v9 = vmul.f32 %v1890_v46, %v2310_v50  ;;  %v597_v10 = vadd.f32 %v565_v47, %v467_v14  ;;  %v923_v12 = vadd.f32 %v891_v34, %v2292_v15 }
  0xee   :  { %v1053_v13 = vadd.f32 %v1021_v6, %v2292_v15  ;;  %v368_v31 = vmul.f32 %v1904_v51, %v2310_v50  ;;  %v1183_v38 = vadd.f32 %v1151_v61, %v2292_v15  ;;  %v498_v19 = vmul.f32 %v1908_v53, %v2310_v50  ;;  %v2362_v15 = vpop.permute.xlu2 %78 }
  0xef   :  { %v1116_v16 = vadd.f32 %v1084_v33, %v986_v56  ;;  %v270_v18 = vadd.f32 %v238_v9, %v2337_v48  ;;  %v727_v41 = vadd.f32 %v695_v8, %v597_v10  ;;  %v825_v20 = vmax.f32 %v793_v49, 0.0 }
  0xf0   :  { %v400_v17 = vadd.f32 %v368_v31, %v2337_v48  ;;  %v628_v21 = vmul.f32 %v1910_v54, %v2310_v50  ;;  %v530_v27 = vadd.f32 %v498_v19, %v2337_v48  ;;  %v758_v29 = vmul.f32 %v1912_v55, %v2310_v50 }
  0xf1   :  { %v1246_v22 = vadd.f32 %v1214_v45, %v1116_v16  ;;  %v302_v23 = vmax.f32 %v270_v18, 0.0  ;;  %v857_v2 = vadd.f32 %v825_v20, %v727_v41  ;;  %v955_v30 = vmax.f32 %v923_v12, 0.0 }
  0xf2   :  { %v432_v24 = vmax.f32 %v400_v17, 0.0  ;;  %v660_v32 = vadd.f32 %v628_v21, %v2337_v48  ;;  %v1085_v36 = vmax.f32 %v1053_v13, 0.0  ;;  %v1215_v5 = vmax.f32 %v1183_v38, 0.0 }
  0xf3   :  { %1381 = vmatpush.msra.mxu0 %v1246_v22  ;;  %1651 = vmatpush.msra.mxu2 %v1246_v22  ;;  %v790_v7 = vadd.f32 %v758_v29, %v2337_v48  ;;  %v888_v28 = vmul.f32 %v1916_v57, %v2310_v50  ;;  %v987_v35 = vadd.f32 %v955_v30, %v857_v2  ;;  %v562_v39 = vmax.f32 %v530_v27, 0.0 }
  0xf4   :  { %v464_v37 = vadd.f32 %v432_v24, %v302_v23  ;;  %v1018_v40 = vmul.f32 %v1918_v58, %v2310_v50  ;;  %v692_v42 = vmax.f32 %v660_v32, 0.0  ;;  %v1148_v11 = vmul.f32 %v1920_v59, %v2310_v50 }
  0xf5   :  { %v920_v26 = vadd.f32 %v888_v28, %v2337_v48  ;;  %v239_v44 = vmul.f32 %v1906_v52, %v2310_v50  ;;  %v1117_v43 = vadd.f32 %v1085_v36, %v987_v35  ;;  %v822_v33 = vmax.f32 %v790_v7, 0.0 }
  0xf6   :  { %v594_v25 = vadd.f32 %v562_v39, %v464_v37  ;;  %v369_v45 = vmul.f32 %v1922_v60, %v2310_v50  ;;  %v1050_v47 = vadd.f32 %v1018_v40, %v2337_v48  ;;  %v1180_v14 = vadd.f32 %v1148_v11, %v2337_v48  ;;  %v2394_v21 = vpop.permute.xlu2 %174 }
  0xf7   :  { %v271_v49 = vadd.f32 %v239_v44, %v2337_v48  ;;  %v499_v34 = vmul.f32 %v1926_v62, %v2310_v50  ;;  %v1247_v6 = vadd.f32 %v1215_v5, %v1117_v43  ;;  %v629_v61 = vmul.f32 %v1928_v63, %v2310_v50  ;;  %v2411_v44 = vpop.permute.xlu1 %73 }
  0xf8   :  { %v724_v56 = vadd.f32 %v692_v42, %v594_v25  ;;  %v401_v8 = vadd.f32 %v369_v45, %v2337_v48  ;;  %v952_v9 = vmax.f32 %v920_v26, 0.0  ;;  %v759_v13 = vmul.f32 %v1930_v0, %v2310_v50 }
  0xf9   :  { %v303_v10 = vmax.f32 %v271_v49, 0.0  ;;  %v531_v12 = vadd.f32 %v499_v34, %v2337_v48  ;;  %1446 = vmatpush.msra.mxu1 %v1247_v6  ;;  %1667 = vmatpush.msra.mxu3 %v1247_v6  ;;  %v661_v38 = vadd.f32 %v629_v61, %v2337_v48  ;;  %v889_v18 = vmul.f32 %v1932_v1, %v2310_v50 }
  0xfa   :  { %v854_v31 = vadd.f32 %v822_v33, %v724_v56  ;;  %v433_v16 = vmax.f32 %v401_v8, 0.0  ;;  %v1082_v19 = vmax.f32 %v1050_v47, 0.0  ;;  %v1212_v41 = vmax.f32 %v1180_v14, 0.0 }
  0xfb   :  { %v791_v20 = vadd.f32 %v759_v13, %v2337_v48  ;;  %v1019_v17 = vmul.f32 %v1936_v3, %v2310_v50  ;;  %v563_v27 = vmax.f32 %v531_v12, 0.0  ;;  %v921_v29 = vadd.f32 %v889_v18, %v2337_v48 }
  0xfc   :  { %v984_v22 = vadd.f32 %v952_v9, %v854_v31  ;;  %v465_v23 = vadd.f32 %v433_v16, %v303_v10  ;;  %v693_v2 = vmax.f32 %v661_v38, 0.0  ;;  %v1149_v24 = vmul.f32 %v1938_v4, %v2310_v50 }
  0xfd   :  { %v1051_v30 = vadd.f32 %v1019_v17, %v2337_v48  ;;  %v236_v32 = vmul.f32 %v1890_v46, %v2362_v15  ;;  %v823_v7 = vmax.f32 %v791_v20, 0.0  ;;  %v366_v28 = vmul.f32 %v1904_v51, %v2362_v15 }
  0xfe   :  { %v1114_v36 = vadd.f32 %v1082_v19, %v984_v22  ;;  %v595_v5 = vadd.f32 %v563_v27, %v465_v23  ;;  %v1181_v35 = vadd.f32 %v1149_v24, %v2337_v48  ;;  %v496_v39 = vmul.f32 %v1908_v53, %v2362_v15 }
  0xff   :  { %v268_v37 = vadd.f32 %v236_v32, %v2394_v21  ;;  %v626_v40 = vmul.f32 %v1910_v54, %v2362_v15  ;;  %v953_v26 = vmax.f32 %v921_v29, 0.0  ;;  %v398_v11 = vadd.f32 %v366_v28, %v2394_v21 }
 0x100   :  { %v1244_v50 = vadd.f32 %v1212_v41, %v1114_v36  ;;  %v725_v42 = vadd.f32 %v693_v2, %v595_v5  ;;  %v528_v25 = vadd.f32 %v496_v39, %v2394_v21  ;;  %v756_v33 = vmul.f32 %v1912_v55, %v2362_v15 }
 0x101   :  { %v300_v43 = vmax.f32 %v268_v37, 0.0  ;;  %v658_v48 = vadd.f32 %v626_v40, %v2394_v21  ;;  %v1083_v47 = vmax.f32 %v1051_v30, 0.0  ;;  %v430_v14 = vmax.f32 %v398_v11, 0.0  ;;  %v2443_v40 = vpop.permute.xlu1 %169 }
 0x102   :  { %1382 = vmatpush.msra.mxu0 %v1244_v50  ;;  %1652 = vmatpush.msra.mxu2 %v1244_v50  ;;  %v855_v45 = vadd.f32 %v823_v7, %v725_v42  ;;  %v886_v49 = vmul.f32 %v1916_v57, %v2362_v15  ;;  %v1213_v34 = vmax.f32 %v1181_v35, 0.0  ;;  %v560_v6 = vmax.f32 %v528_v25, 0.0 }
 0x103   :  { %v788_v56 = vadd.f32 %v756_v33, %v2394_v21  ;;  %v1016_v8 = vmul.f32 %v1918_v58, %v2362_v15  ;;  %v462_v9 = vadd.f32 %v430_v14, %v300_v43  ;;  %v1146_v12 = vmul.f32 %v1920_v59, %v2362_v15 }
 0x104   :  { %v985_v61 = vadd.f32 %v953_v26, %v855_v45  ;;  %v918_v10 = vadd.f32 %v886_v49, %v2394_v21  ;;  %v690_v13 = vmax.f32 %v658_v48, 0.0  ;;  %v237_v16 = vmul.f32 %v1906_v52, %v2362_v15 }
 0x105   :  { %v1048_v31 = vadd.f32 %v1016_v8, %v2394_v21  ;;  %v367_v38 = vmul.f32 %v1922_v60, %v2362_v15  ;;  %v592_v19 = vadd.f32 %v560_v6, %v462_v9  ;;  %v1178_v41 = vadd.f32 %v1146_v12, %v2394_v21 }
 0x106   :  { %v1115_v18 = vadd.f32 %v1083_v47, %v985_v61  ;;  %v497_v20 = vmul.f32 %v1926_v62, %v2362_v15  ;;  %v820_v17 = vmax.f32 %v788_v56, 0.0  ;;  %v269_v22 = vadd.f32 %v237_v16, %v2394_v21 }
 0x107   :  { %v399_v23 = vadd.f32 %v367_v38, %v2394_v21  ;;  %v627_v27 = vmul.f32 %v1928_v63, %v2362_v15  ;;  %v722_v2 = vadd.f32 %v690_v13, %v592_v19  ;;  %v950_v30 = vmax.f32 %v918_v10, 0.0 }
 0x108   :  { %v1245_v29 = vadd.f32 %v1213_v34, %v1115_v18  ;;  %v529_v24 = vadd.f32 %v497_v20, %v2394_v21  ;;  %v301_v32 = vmax.f32 %v269_v22, 0.0  ;;  %v757_v7 = vmul.f32 %v1930_v0, %v2362_v15 }
 0x109   :  { %v431_v36 = vmax.f32 %v399_v23, 0.0  ;;  %v659_v5 = vadd.f32 %v627_v27, %v2394_v21  ;;  %v852_v28 = vadd.f32 %v820_v17, %v722_v2  ;;  %v1080_v35 = vmax.f32 %v1048_v31, 0.0 }
 0x10a   :  { %1447 = vmatpush.msra.mxu1 %v1245_v29  ;;  %1668 = vmatpush.msra.mxu3 %v1245_v29  ;;  %v1210_v37 = vmax.f32 %v1178_v41, 0.0  ;;  %v887_v39 = vmul.f32 %v1932_v1, %v2362_v15  ;;  %v561_v42 = vmax.f32 %v529_v24, 0.0  ;;  %v789_v26 = vadd.f32 %v757_v7, %v2394_v21 }
 0x10b   :  { %v463_v50 = vadd.f32 %v431_v36, %v301_v32  ;;  %v1017_v11 = vmul.f32 %v1936_v3, %v2362_v15  ;;  %v982_v43 = vadd.f32 %v950_v30, %v852_v28  ;;  %v691_v25 = vmax.f32 %v659_v5, 0.0 }
 0x10c   :  { %v1147_v48 = vmul.f32 %v1938_v4, %v2362_v15  ;;  %v234_v33 = vmul.f32 %v1890_v46, %v2411_v44  ;;  %v919_v47 = vadd.f32 %v887_v39, %v2394_v21  ;;  %v364_v49 = vmul.f32 %v1904_v51, %v2411_v44 }
 0x10d   :  { %v593_v45 = vadd.f32 %v561_v42, %v463_v50  ;;  %v1049_v14 = vadd.f32 %v1017_v11, %v2394_v21  ;;  %v1112_v34 = vadd.f32 %v1080_v35, %v982_v43  ;;  %v494_v8 = vmul.f32 %v1908_v53, %v2411_v44 }
 0x10e   :  { %v1179_v6 = vadd.f32 %v1147_v48, %v2394_v21  ;;  %v266_v56 = vadd.f32 %v234_v33, %v2443_v40  ;;  %v821_v61 = vmax.f32 %v789_v26, 0.0  ;;  %v396_v9 = vadd.f32 %v364_v49, %v2443_v40  ;;  %v2466_v21 = vpop.permute.xlu0 %68 }
 0x10f   :  { %v723_v15 = vadd.f32 %v691_v25, %v593_v45  ;;  %v624_v10 = vmul.f32 %v1910_v54, %v2411_v44  ;;  %v1242_v12 = vadd.f32 %v1210_v37, %v1112_v34  ;;  %v526_v31 = vadd.f32 %v494_v8, %v2443_v40 }
 0x110   :  { %v298_v13 = vmax.f32 %v266_v56, 0.0  ;;  %v754_v16 = vmul.f32 %v1912_v55, %v2411_v44  ;;  %v951_v18 = vmax.f32 %v919_v47, 0.0  ;;  %v428_v19 = vmax.f32 %v396_v9, 0.0 }
 0x111   :  { %v853_v38 = vadd.f32 %v821_v61, %v723_v15  ;;  %v656_v41 = vadd.f32 %v624_v10, %v2443_v40  ;;  %1383 = vmatpush.msra.mxu0 %v1242_v12  ;;  %1653 = vmatpush.msra.mxu2 %v1242_v12  ;;  %v1081_v20 = vmax.f32 %v1049_v14, 0.0  ;;  %v1211_v17 = vmax.f32 %v1179_v6, 0.0 }
 0x112   :  { %v786_v22 = vadd.f32 %v754_v16, %v2443_v40  ;;  %v884_v23 = vmul.f32 %v1916_v57, %v2411_v44  ;;  %v460_v29 = vadd.f32 %v428_v19, %v298_v13  ;;  %v558_v2 = vmax.f32 %v526_v31, 0.0 }
 0x113   :  { %v983_v27 = vadd.f32 %v951_v18, %v853_v38  ;;  %v1014_v30 = vmul.f32 %v1918_v58, %v2411_v44  ;;  %v688_v24 = vmax.f32 %v656_v41, 0.0  ;;  %v1144_v36 = vmul.f32 %v1920_v59, %v2411_v44 }
 0x114   :  { %v916_v32 = vadd.f32 %v884_v23, %v2443_v40  ;;  %v235_v5 = vmul.f32 %v1906_v52, %v2411_v44  ;;  %v590_v28 = vadd.f32 %v558_v2, %v460_v29  ;;  %v818_v35 = vmax.f32 %v786_v22, 0.0 }
 0x115   :  { %v1113_v7 = vadd.f32 %v1081_v20, %v983_v27  ;;  %v365_v37 = vmul.f32 %v1922_v60, %v2411_v44  ;;  %v1046_v39 = vadd.f32 %v1014_v30, %v2443_v40  ;;  %v1176_v50 = vadd.f32 %v1144_v36, %v2443_v40 }
 0x116   :  { %v267_v42 = vadd.f32 %v235_v5, %v2443_v40  ;;  %v495_v26 = vmul.f32 %v1926_v62, %v2411_v44  ;;  %v720_v43 = vadd.f32 %v688_v24, %v590_v28  ;;  %v625_v48 = vmul.f32 %v1928_v63, %v2411_v44  ;;  %v2498_v10 = vpop.permute.xlu0 %164  ;;  %v2515_v5 = vpop.permute.xlu2 %63 }
 0x117   :  { %v1243_v11 = vadd.f32 %v1211_v17, %v1113_v7  ;;  %v397_v25 = vadd.f32 %v365_v37, %v2443_v40  ;;  %v948_v33 = vmax.f32 %v916_v32, 0.0  ;;  %v755_v14 = vmul.f32 %v1930_v0, %v2411_v44 }
 0x118   :  { %v299_v45 = vmax.f32 %v267_v42, 0.0  ;;  %v527_v47 = vadd.f32 %v495_v26, %v2443_v40  ;;  %v850_v49 = vadd.f32 %v818_v35, %v720_v43  ;;  %v657_v6 = vadd.f32 %v625_v48, %v2443_v40 }
 0x119   :  { %1448 = vmatpush.msra.mxu1 %v1243_v11  ;;  %1669 = vmatpush.msra.mxu3 %v1243_v11  ;;  %v429_v34 = vmax.f32 %v397_v25, 0.0  ;;  %v885_v56 = vmul.f32 %v1932_v1, %v2411_v44  ;;  %v1078_v8 = vmax.f32 %v1046_v39, 0.0  ;;  %v1208_v15 = vmax.f32 %v1176_v50, 0.0 }
 0x11a   :  { %v787_v61 = vadd.f32 %v755_v14, %v2443_v40  ;;  %v1015_v9 = vmul.f32 %v1936_v3, %v2411_v44  ;;  %v980_v12 = vadd.f32 %v948_v33, %v850_v49  ;;  %v559_v31 = vmax.f32 %v527_v47, 0.0 }
 0x11b   :  { %v461_v13 = vadd.f32 %v429_v34, %v299_v45  ;;  %v917_v16 = vadd.f32 %v885_v56, %v2443_v40  ;;  %v689_v38 = vmax.f32 %v657_v6, 0.0  ;;  %v1145_v19 = vmul.f32 %v1938_v4, %v2411_v44 }
 0x11c   :  { %v1047_v18 = vadd.f32 %v1015_v9, %v2443_v40  ;;  %v232_v41 = vmul.f32 %v1890_v46, %v2466_v21  ;;  %v1110_v20 = vadd.f32 %v1078_v8, %v980_v12  ;;  %v819_v22 = vmax.f32 %v787_v61, 0.0 }
 0x11d   :  { %v591_v17 = vadd.f32 %v559_v31, %v461_v13  ;;  %v362_v23 = vmul.f32 %v1904_v51, %v2466_v21  ;;  %v1177_v27 = vadd.f32 %v1145_v19, %v2443_v40  ;;  %v492_v2 = vmul.f32 %v1908_v53, %v2466_v21 }
 0x11e   :  { %v264_v29 = vadd.f32 %v232_v41, %v2498_v10  ;;  %v622_v30 = vmul.f32 %v1910_v54, %v2466_v21  ;;  %v1240_v44 = vadd.f32 %v1208_v15, %v1110_v20  ;;  %v949_v32 = vmax.f32 %v917_v16, 0.0 }
 0x11f   :  { %v721_v24 = vadd.f32 %v689_v38, %v591_v17  ;;  %v394_v36 = vadd.f32 %v362_v23, %v2498_v10  ;;  %v524_v28 = vadd.f32 %v492_v2, %v2498_v10  ;;  %v752_v35 = vmul.f32 %v1912_v55, %v2466_v21 }
 0x120   :  { %v296_v7 = vmax.f32 %v264_v29, 0.0  ;;  %v654_v40 = vadd.f32 %v622_v30, %v2498_v10  ;;  %1384 = vmatpush.msra.mxu0 %v1240_v44  ;;  %1654 = vmatpush.msra.mxu2 %v1240_v44  ;;  %v1079_v39 = vmax.f32 %v1047_v18, 0.0  ;;  %v882_v42 = vmul.f32 %v1916_v57, %v2466_v21  ;;  %v2547_v30 = vpop.permute.xlu2 %159 }
 0x121   :  { %v851_v37 = vadd.f32 %v819_v22, %v721_v24  ;;  %v426_v50 = vmax.f32 %v394_v36, 0.0  ;;  %v1209_v26 = vmax.f32 %v1177_v27, 0.0  ;;  %v556_v11 = vmax.f32 %v524_v28, 0.0 }
 0x122   :  { %v784_v43 = vadd.f32 %v752_v35, %v2498_v10  ;;  %v1012_v25 = vmul.f32 %v1918_v58, %v2466_v21  ;;  %v914_v45 = vadd.f32 %v882_v42, %v2498_v10  ;;  %v1142_v47 = vmul.f32 %v1920_v59, %v2466_v21 }
 0x123   :  { %v981_v48 = vadd.f32 %v949_v32, %v851_v37  ;;  %v458_v33 = vadd.f32 %v426_v50, %v296_v7  ;;  %v686_v14 = vmax.f32 %v654_v40, 0.0  ;;  %v233_v34 = vmul.f32 %v1906_v52, %v2466_v21 }
 0x124   :  { %v1044_v49 = vadd.f32 %v1012_v25, %v2498_v10  ;;  %v363_v6 = vmul.f32 %v1922_v60, %v2466_v21  ;;  %v1174_v15 = vadd.f32 %v1142_v47, %v2498_v10  ;;  %v493_v61 = vmul.f32 %v1926_v62, %v2466_v21 }
 0x125   :  { %v1111_v56 = vadd.f32 %v1079_v39, %v981_v48  ;;  %v588_v8 = vadd.f32 %v556_v11, %v458_v33  ;;  %v816_v9 = vmax.f32 %v784_v43, 0.0  ;;  %v265_v12 = vadd.f32 %v233_v34, %v2498_v10 }
 0x126   :  { %v395_v13 = vadd.f32 %v363_v6, %v2498_v10  ;;  %v623_v31 = vmul.f32 %v1928_v63, %v2466_v21  ;;  %v946_v18 = vmax.f32 %v914_v45, 0.0  ;;  %v525_v19 = vadd.f32 %v493_v61, %v2498_v10 }
 0x127   :  { %v1241_v16 = vadd.f32 %v1209_v26, %v1111_v56  ;;  %v718_v38 = vadd.f32 %v686_v14, %v588_v8  ;;  %v297_v41 = vmax.f32 %v265_v12, 0.0  ;;  %v753_v22 = vmul.f32 %v1930_v0, %v2466_v21 }
 0x128   :  { %v427_v20 = vmax.f32 %v395_v13, 0.0  ;;  %v655_v17 = vadd.f32 %v623_v31, %v2498_v10  ;;  %v1076_v27 = vmax.f32 %v1044_v49, 0.0  ;;  %v1206_v29 = vmax.f32 %v1174_v15, 0.0 }
 0x129   :  { %1449 = vmatpush.msra.mxu1 %v1241_v16  ;;  %1670 = vmatpush.msra.mxu3 %v1241_v16  ;;  %v848_v23 = vadd.f32 %v816_v9, %v718_v38  ;;  %v883_v2 = vmul.f32 %v1932_v1, %v2466_v21  ;;  %v557_v24 = vmax.f32 %v525_v19, 0.0  ;;  %v785_v32 = vadd.f32 %v753_v22, %v2498_v10 }
 0x12a   :  { %v459_v44 = vadd.f32 %v427_v20, %v297_v41  ;;  %v1013_v36 = vmul.f32 %v1936_v3, %v2466_v21  ;;  %v687_v28 = vmax.f32 %v655_v17, 0.0  ;;  %v1143_v40 = vmul.f32 %v1938_v4, %v2466_v21 }
 0x12b   :  { %v978_v7 = vadd.f32 %v946_v18, %v848_v23  ;;  %v230_v35 = vmul.f32 %v1890_v46, %v2515_v5  ;;  %v915_v39 = vadd.f32 %v883_v2, %v2498_v10  ;;  %v360_v42 = vmul.f32 %v1904_v51, %v2515_v5 }
 0x12c   :  { %v589_v37 = vadd.f32 %v557_v24, %v459_v44  ;;  %v1045_v50 = vadd.f32 %v1013_v36, %v2498_v10  ;;  %v1175_v11 = vadd.f32 %v1143_v40, %v2498_v10  ;;  %v490_v25 = vmul.f32 %v1908_v53, %v2515_v5  ;;  %v2570_v10 = vpop.permute.xlu1 %58 }
 0x12d   :  { %v1108_v26 = vadd.f32 %v1076_v27, %v978_v7  ;;  %v262_v43 = vadd.f32 %v230_v35, %v2547_v30  ;;  %v817_v48 = vmax.f32 %v785_v32, 0.0  ;;  %v392_v33 = vadd.f32 %v360_v42, %v2547_v30 }
 0x12e   :  { %v719_v21 = vadd.f32 %v687_v28, %v589_v37  ;;  %v620_v45 = vmul.f32 %v1910_v54, %v2515_v5  ;;  %v522_v49 = vadd.f32 %v490_v25, %v2547_v30  ;;  %v750_v34 = vmul.f32 %v1912_v55, %v2515_v5 }
 0x12f   :  { %v1238_v47 = vadd.f32 %v1206_v29, %v1108_v26  ;;  %v294_v14 = vmax.f32 %v262_v43, 0.0  ;;  %v947_v56 = vmax.f32 %v915_v39, 0.0  ;;  %v424_v8 = vmax.f32 %v392_v33, 0.0 }
 0x130   :  { %v849_v6 = vadd.f32 %v817_v48, %v719_v21  ;;  %v652_v15 = vadd.f32 %v620_v45, %v2547_v30  ;;  %v1077_v61 = vmax.f32 %v1045_v50, 0.0  ;;  %v1207_v9 = vmax.f32 %v1175_v11, 0.0 }
 0x131   :  { %1385 = vmatpush.msra.mxu0 %v1238_v47  ;;  %1655 = vmatpush.msra.mxu2 %v1238_v47  ;;  %v782_v12 = vadd.f32 %v750_v34, %v2547_v30  ;;  %v880_v13 = vmul.f32 %v1916_v57, %v2515_v5  ;;  %v456_v16 = vadd.f32 %v424_v8, %v294_v14  ;;  %v554_v38 = vmax.f32 %v522_v49, 0.0 }
 0x132   :  { %v979_v31 = vadd.f32 %v947_v56, %v849_v6  ;;  %v1010_v18 = vmul.f32 %v1918_v58, %v2515_v5  ;;  %v684_v19 = vmax.f32 %v652_v15, 0.0  ;;  %v1140_v20 = vmul.f32 %v1920_v59, %v2515_v5 }
 0x133   :  { %v912_v41 = vadd.f32 %v880_v13, %v2547_v30  ;;  %v231_v17 = vmul.f32 %v1906_v52, %v2515_v5  ;;  %v586_v23 = vadd.f32 %v554_v38, %v456_v16  ;;  %v814_v27 = vmax.f32 %v782_v12, 0.0 }
 0x134   :  { %v1109_v22 = vadd.f32 %v1077_v61, %v979_v31  ;;  %v361_v29 = vmul.f32 %v1922_v60, %v2515_v5  ;;  %v1042_v2 = vadd.f32 %v1010_v18, %v2547_v30  ;;  %v1172_v44 = vadd.f32 %v1140_v20, %v2547_v30  ;;  %v2602_v45 = vpop.permute.xlu1 %154 }
 0x135   :  { %v263_v24 = vadd.f32 %v231_v17, %v2547_v30  ;;  %v491_v32 = vmul.f32 %v1926_v62, %v2515_v5  ;;  %v716_v7 = vadd.f32 %v684_v19, %v586_v23  ;;  %v621_v40 = vmul.f32 %v1928_v63, %v2515_v5  ;;  %v2619_v17 = vpop.permute.xlu0 %53 }
 0x136   :  { %v1239_v36 = vadd.f32 %v1207_v9, %v1109_v22  ;;  %v393_v28 = vadd.f32 %v361_v29, %v2547_v30  ;;  %v944_v35 = vmax.f32 %v912_v41, 0.0  ;;  %v751_v50 = vmul.f32 %v1930_v0, %v2515_v5 }
 0x137   :  { %v295_v37 = vmax.f32 %v263_v24, 0.0  ;;  %v523_v39 = vadd.f32 %v491_v32, %v2547_v30  ;;  %v846_v42 = vadd.f32 %v814_v27, %v716_v7  ;;  %v653_v11 = vadd.f32 %v621_v40, %v2547_v30 }
 0x138   :  { %1450 = vmatpush.msra.mxu1 %v1239_v36  ;;  %1671 = vmatpush.msra.mxu3 %v1239_v36  ;;  %v425_v26 = vmax.f32 %v393_v28, 0.0  ;;  %v881_v43 = vmul.f32 %v1932_v1, %v2515_v5  ;;  %v1074_v25 = vmax.f32 %v1042_v2, 0.0  ;;  %v1204_v21 = vmax.f32 %v1172_v44, 0.0 }
 0x139   :  { %v783_v48 = vadd.f32 %v751_v50, %v2547_v30  ;;  %v1011_v33 = vmul.f32 %v1936_v3, %v2515_v5  ;;  %v976_v47 = vadd.f32 %v944_v35, %v846_v42  ;;  %v555_v49 = vmax.f32 %v523_v39, 0.0 }
 0x13a   :  { %v457_v14 = vadd.f32 %v425_v26, %v295_v37  ;;  %v913_v34 = vadd.f32 %v881_v43, %v2547_v30  ;;  %v685_v6 = vmax.f32 %v653_v11, 0.0  ;;  %v1141_v8 = vmul.f32 %v1938_v4, %v2515_v5 }
 0x13b   :  { %v1043_v56 = vadd.f32 %v1011_v33, %v2547_v30  ;;  %v228_v15 = vmul.f32 %v1890_v46, %v2570_v10  ;;  %v1106_v61 = vadd.f32 %v1074_v25, %v976_v47  ;;  %v815_v12 = vmax.f32 %v783_v48, 0.0 }
 0x13c   :  { %v587_v9 = vadd.f32 %v555_v49, %v457_v14  ;;  %v358_v13 = vmul.f32 %v1904_v51, %v2570_v10  ;;  %v1173_v31 = vadd.f32 %v1141_v8, %v2547_v30  ;;  %v488_v38 = vmul.f32 %v1908_v53, %v2570_v10 }
 0x13d   :  { %v260_v16 = vadd.f32 %v228_v15, %v2602_v45  ;;  %v618_v18 = vmul.f32 %v1910_v54, %v2570_v10  ;;  %v1236_v5 = vadd.f32 %v1204_v21, %v1106_v61  ;;  %v945_v41 = vmax.f32 %v913_v34, 0.0 }
 0x13e   :  { %v717_v19 = vadd.f32 %v685_v6, %v587_v9  ;;  %v390_v20 = vadd.f32 %v358_v13, %v2602_v45  ;;  %v520_v23 = vadd.f32 %v488_v38, %v2602_v45  ;;  %v748_v27 = vmul.f32 %v1912_v55, %v2570_v10 }
 0x13f   :  { %v292_v22 = vmax.f32 %v260_v16, 0.0  ;;  %v650_v30 = vadd.f32 %v618_v18, %v2602_v45  ;;  %1386 = vmatpush.msra.mxu0 %v1236_v5  ;;  %1656 = vmatpush.msra.mxu2 %v1236_v5  ;;  %v1075_v2 = vmax.f32 %v1043_v56, 0.0  ;;  %v878_v24 = vmul.f32 %v1916_v57, %v2570_v10  ;;  %v2651_v18 = vpop.permute.xlu0 %149 }
 0x140   :  { %v847_v29 = vadd.f32 %v815_v12, %v717_v19  ;;  %v422_v44 = vmax.f32 %v390_v20, 0.0  ;;  %v1205_v32 = vmax.f32 %v1173_v31, 0.0  ;;  %v552_v36 = vmax.f32 %v520_v23, 0.0 }
 0x141   :  { %v780_v7 = vadd.f32 %v748_v27, %v2602_v45  ;;  %v1008_v28 = vmul.f32 %v1918_v58, %v2570_v10  ;;  %v910_v37 = vadd.f32 %v878_v24, %v2602_v45  ;;  %v1138_v39 = vmul.f32 %v1920_v59, %v2570_v10 }
 0x142   :  { %v977_v40 = vadd.f32 %v945_v41, %v847_v29  ;;  %v454_v35 = vadd.f32 %v422_v44, %v292_v22  ;;  %v682_v50 = vmax.f32 %v650_v30, 0.0  ;;  %v229_v26 = vmul.f32 %v1906_v52, %v2570_v10 }
 0x143   :  { %v1040_v42 = vadd.f32 %v1008_v28, %v2602_v45  ;;  %v359_v11 = vmul.f32 %v1922_v60, %v2570_v10  ;;  %v1170_v21 = vadd.f32 %v1138_v39, %v2602_v45  ;;  %v489_v48 = vmul.f32 %v1926_v62, %v2570_v10 }
 0x144   :  { %v1107_v43 = vadd.f32 %v1075_v2, %v977_v40  ;;  %v584_v25 = vadd.f32 %v552_v36, %v454_v35  ;;  %v812_v33 = vmax.f32 %v780_v7, 0.0  ;;  %v261_v47 = vadd.f32 %v229_v26, %v2602_v45 }
 0x145   :  { %v391_v14 = vadd.f32 %v359_v11, %v2602_v45  ;;  %v619_v49 = vmul.f32 %v1928_v63, %v2570_v10  ;;  %v942_v56 = vmax.f32 %v910_v37, 0.0  ;;  %v521_v8 = vadd.f32 %v489_v48, %v2602_v45 }
 0x146   :  { %v1237_v34 = vadd.f32 %v1205_v32, %v1107_v43  ;;  %v714_v6 = vadd.f32 %v682_v50, %v584_v25  ;;  %v293_v15 = vmax.f32 %v261_v47, 0.0  ;;  %v749_v12 = vmul.f32 %v1930_v0, %v2570_v10 }
 0x147   :  { %v423_v61 = vmax.f32 %v391_v14, 0.0  ;;  %v651_v9 = vadd.f32 %v619_v49, %v2602_v45  ;;  %v1072_v31 = vmax.f32 %v1040_v42, 0.0  ;;  %v1202_v16 = vmax.f32 %v1170_v21, 0.0 }
 0x148   :  { %1451 = vmatpush.msra.mxu1 %v1237_v34  ;;  %1672 = vmatpush.msra.mxu3 %v1237_v34  ;;  %v844_v13 = vadd.f32 %v812_v33, %v714_v6  ;;  %v879_v38 = vmul.f32 %v1932_v1, %v2570_v10  ;;  %v553_v19 = vmax.f32 %v521_v8, 0.0  ;;  %v781_v41 = vadd.f32 %v749_v12, %v2602_v45 }
 0x149   :  { %v455_v5 = vadd.f32 %v423_v61, %v293_v15  ;;  %v1009_v20 = vmul.f32 %v1936_v3, %v2570_v10  ;;  %v683_v23 = vmax.f32 %v651_v9, 0.0  ;;  %v1139_v30 = vmul.f32 %v1938_v4, %v2570_v10 }
 0x14a   :  { %v974_v22 = vadd.f32 %v942_v56, %v844_v13  ;;  %v226_v27 = vmul.f32 %v1890_v46, %v2619_v17  ;;  %v911_v2 = vadd.f32 %v879_v38, %v2602_v45  ;;  %v356_v24 = vmul.f32 %v1904_v51, %v2619_v17 }
 0x14b   :  { %v585_v29 = vadd.f32 %v553_v19, %v455_v5  ;;  %v1041_v44 = vadd.f32 %v1009_v20, %v2602_v45  ;;  %v1171_v36 = vadd.f32 %v1139_v30, %v2602_v45  ;;  %v486_v28 = vmul.f32 %v1908_v53, %v2619_v17 }
 0x14c   :  { %v1104_v32 = vadd.f32 %v1072_v31, %v974_v22  ;;  %v258_v7 = vadd.f32 %v226_v27, %v2651_v18  ;;  %v813_v40 = vmax.f32 %v781_v41, 0.0  ;;  %v388_v35 = vadd.f32 %v356_v24, %v2651_v18 }
 0x14d   :  { %v715_v10 = vadd.f32 %v683_v23, %v585_v29  ;;  %v616_v37 = vmul.f32 %v1910_v54, %v2619_v17  ;;  %v518_v42 = vadd.f32 %v486_v28, %v2651_v18  ;;  %v746_v26 = vmul.f32 %v1912_v55, %v2619_v17 }
 0x14e   :  { %v1234_v39 = vadd.f32 %v1202_v16, %v1104_v32  ;;  %v290_v50 = vmax.f32 %v258_v7, 0.0  ;;  %v943_v11 = vmax.f32 %v911_v2, 0.0  ;;  %v420_v43 = vmax.f32 %v388_v35, 0.0  ;;  %v2696_v2 = vpop.permute.xlu2 %48  ;;  %v2705_v35 = vpop.permute.xlu1 %144 }
 0x14f   :  { %v845_v45 = vadd.f32 %v813_v40, %v715_v10  ;;  %v648_v25 = vadd.f32 %v616_v37, %v2651_v18  ;;  %v1073_v21 = vmax.f32 %v1041_v44, 0.0  ;;  %v1203_v48 = vmax.f32 %v1171_v36, 0.0 }
 0x150   :  { %1387 = vmatpush.msra.mxu0 %v1234_v39  ;;  %1657 = vmatpush.msra.mxu2 %v1234_v39  ;;  %v778_v33 = vadd.f32 %v746_v26, %v2651_v18  ;;  %v876_v47 = vmul.f32 %v1916_v57, %v2619_v17  ;;  %v452_v49 = vadd.f32 %v420_v43, %v290_v50  ;;  %v550_v34 = vmax.f32 %v518_v42, 0.0 }
 0x151   :  { %v975_v14 = vadd.f32 %v943_v11, %v845_v45  ;;  %v1006_v6 = vmul.f32 %v1918_v58, %v2619_v17  ;;  %v680_v56 = vmax.f32 %v648_v25, 0.0  ;;  %v1136_v15 = vmul.f32 %v1920_v59, %v2619_v17 }
 0x152   :  { %v908_v8 = vadd.f32 %v876_v47, %v2651_v18  ;;  %v227_v61 = vmul.f32 %v1906_v52, %v2619_v17  ;;  %v582_v12 = vadd.f32 %v550_v34, %v452_v49  ;;  %v810_v13 = vmax.f32 %v778_v33, 0.0 }
 0x153   :  { %v1105_v9 = vadd.f32 %v1073_v21, %v975_v14  ;;  %v357_v31 = vmul.f32 %v1922_v60, %v2619_v17  ;;  %v1038_v16 = vadd.f32 %v1006_v6, %v2651_v18  ;;  %v1168_v38 = vadd.f32 %v1136_v15, %v2651_v18 }
 0x154   :  { %v259_v5 = vadd.f32 %v227_v61, %v2651_v18  ;;  %v487_v19 = vmul.f32 %v1926_v62, %v2619_v17  ;;  %v712_v20 = vadd.f32 %v680_v56, %v582_v12  ;;  %v617_v23 = vmul.f32 %v1928_v63, %v2619_v17 }
 0x155   :  { %v1235_v41 = vadd.f32 %v1203_v48, %v1105_v9  ;;  %v389_v22 = vadd.f32 %v357_v31, %v2651_v18  ;;  %v940_v30 = vmax.f32 %v908_v8, 0.0  ;;  %v747_v36 = vmul.f32 %v1930_v0, %v2619_v17 }
 0x156   :  { %v291_v27 = vmax.f32 %v259_v5, 0.0  ;;  %v519_v29 = vadd.f32 %v487_v19, %v2651_v18  ;;  %v842_v44 = vadd.f32 %v810_v13, %v712_v20  ;;  %v649_v32 = vadd.f32 %v617_v23, %v2651_v18 }
 0x157   :  { %1452 = vmatpush.msra.mxu1 %v1235_v41  ;;  %1673 = vmatpush.msra.mxu3 %v1235_v41  ;;  %v421_v24 = vmax.f32 %v389_v22, 0.0  ;;  %v1070_v7 = vmax.f32 %v1038_v16, 0.0  ;;  %v1200_v28 = vmax.f32 %v1168_v38, 0.0  ;;  %v877_v10 = vmul.f32 %v1932_v1, %v2619_v17 }
 0x158   :  { %v1007_v40 = vmul.f32 %v1936_v3, %v2619_v17  ;;  %v972_v37 = vadd.f32 %v940_v30, %v842_v44  ;;  %v551_v50 = vmax.f32 %v519_v29, 0.0  ;;  %v779_v42 = vadd.f32 %v747_v36, %v2651_v18 }
 0x159   :  { %v453_v39 = vadd.f32 %v421_v24, %v291_v27  ;;  %v681_v26 = vmax.f32 %v649_v32, 0.0  ;;  %v909_v45 = vadd.f32 %v877_v10, %v2651_v18  ;;  %v1137_v11 = vmul.f32 %v1938_v4, %v2619_v17 }
 0x15a   :  { %v224_v43 = vmul.f32 %v1890_v46, %v2696_v2  ;;  %v1102_v25 = vadd.f32 %v1070_v7, %v972_v37  ;;  %v1039_v48 = vadd.f32 %v1007_v40, %v2651_v18  ;;  %v354_v33 = vmul.f32 %v1904_v51, %v2696_v2 }
 0x15b   :  { %v583_v21 = vadd.f32 %v551_v50, %v453_v39  ;;  %v1169_v47 = vadd.f32 %v1137_v11, %v2651_v18  ;;  %v484_v49 = vmul.f32 %v1908_v53, %v2696_v2  ;;  %v614_v17 = vmul.f32 %v1910_v54, %v2696_v2 }
 0x15c   :  { %v256_v14 = vadd.f32 %v224_v43, %v2705_v35  ;;  %v1232_v34 = vadd.f32 %v1200_v28, %v1102_v25  ;;  %v811_v46 = vmax.f32 %v779_v42, 0.0  ;;  %v386_v56 = vadd.f32 %v354_v33, %v2705_v35 }
 0x15d   :  { %v713_v6 = vadd.f32 %v681_v26, %v583_v21  ;;  %v516_v15 = vadd.f32 %v484_v49, %v2705_v35  ;;  %v646_v51 = vadd.f32 %v614_v17, %v2705_v35  ;;  %v744_v18 = vmul.f32 %v1912_v55, %v2696_v2 }
 0x15e   :  { %v288_v8 = vmax.f32 %v256_v14, 0.0  ;;  %1388 = vmatpush.msra.mxu0 %v1232_v34  ;;  %1658 = vmatpush.msra.mxu2 %v1232_v34  ;;  %v941_v53 = vmax.f32 %v909_v45, 0.0  ;;  %v418_v9 = vmax.f32 %v386_v56, 0.0  ;;  %v1071_v12 = vmax.f32 %v1039_v48, 0.0  ;;  %v1271_v34 = vld [vmem:[%s2872_s3 + $0x48] sm:$0xff] }
 0x15f   :  { %v843_v61 = vadd.f32 %v811_v46, %v713_v6  ;;  %v1201_v54 = vmax.f32 %v1169_v47, 0.0  ;;  %v776_v13 = vadd.f32 %v744_v18, %v2705_v35  ;;  %v874_v31 = vmul.f32 %v1916_v57, %v2696_v2  ;;  %v1272_v18 = vld [vmem:[%s2872_s3 + $0x50] sm:$0xff] }
 0x160   :  { %v450_v38 = vadd.f32 %v418_v9, %v288_v8  ;;  %v548_v5 = vmax.f32 %v516_v15, 0.0  ;;  %v1004_v19 = vmul.f32 %v1918_v58, %v2696_v2  ;;  %v678_v41 = vmax.f32 %v646_v51, 0.0  ;;  %v1263_v51 = vld [vmem:[%s2872_s3 + $0x8] sm:$0xff]  ;;  %v1274_v9 = vld [vmem:[%s2872_s3 + $0x60] sm:$0xff] }
 0x161   :  { %v973_v16 = vadd.f32 %v941_v53, %v843_v61  ;;  %v906_v55 = vadd.f32 %v874_v31, %v2705_v35  ;;  %v225_v20 = vmul.f32 %v1906_v52, %v2696_v2  ;;  %v355_v22 = vmul.f32 %v1922_v60, %v2696_v2  ;;  %v1273_v61 = vld [vmem:[%s2872_s3 + $0x58] sm:$0xff]  ;;  %v1276_v31 = vld [vmem:[%s2872_s3 + $0x70] sm:$0xff] }
 0x162   :  { %v580_v30 = vadd.f32 %v548_v5, %v450_v38  ;;  %v1134_v57 = vmul.f32 %v1920_v59, %v2696_v2  ;;  %v485_v27 = vmul.f32 %v1926_v62, %v2696_v2  ;;  %v808_v29 = vmax.f32 %v776_v13, 0.0  ;;  %v1265_v53 = vld [vmem:[%s2872_s3 + $0x18] sm:$0xff]  ;;  %v1267_v13 = vld [vmem:[%s2872_s3 + $0x28] sm:$0xff] }
 0x163   :  { %v1103_v23 = vadd.f32 %v1071_v12, %v973_v16  ;;  %v257_v58 = vadd.f32 %v225_v20, %v2705_v35  ;;  %v387_v44 = vadd.f32 %v355_v22, %v2705_v35  ;;  %v615_v24 = vmul.f32 %v1928_v63, %v2696_v2  ;;  %v1266_v12 = vld [vmem:[%s2872_s3 + $0x20] sm:$0xff]  ;;  %v1268_v16 = vld [vmem:[%s2872_s3 + $0x30] sm:$0xff]  ;;  %v1277_v38 = vld [vmem:[%s2872_s3 + $0x78] sm:$0xff] }
 0x164   :  { %v710_v32 = vadd.f32 %v678_v41, %v580_v30  ;;  %v1036_v60 = vadd.f32 %v1004_v19, %v2705_v35  ;;  %v517_v36 = vadd.f32 %v485_v27, %v2705_v35  ;;  %v745_v62 = vmul.f32 %v1930_v0, %v2696_v2  ;;  %v1269_v5 = vld [vmem:[%s2872_s3 + $0x38] sm:$0xff]  ;;  %v1270_v19 = vld [vmem:[%s2872_s3 + $0x40] sm:$0xff] }
 0x165   :  { %v1233_v52 = vadd.f32 %v1201_v54, %v1103_v23  ;;  %v289_v7 = vmax.f32 %v257_v58, 0.0  ;;  %v419_v28 = vmax.f32 %v387_v44, 0.0  ;;  %v647_v59 = vadd.f32 %v615_v24, %v2705_v35  ;;  %v1275_v54 = vld [vmem:[%s2872_s3 + $0x68] sm:$0xff] }
 0x166   :  { %v840_v10 = vadd.f32 %v808_v29, %v710_v32  ;;  %v938_v40 = vmax.f32 %v906_v55, 0.0  ;;  %v1166_v37 = vadd.f32 %v1134_v57, %v2705_v35  ;;  %v549_v39 = vmax.f32 %v517_v36, 0.0  ;;  %v1372_v36 = vpop.permute.xlu2 %1371 }
 0x167   :  { %1453 = vmatpush.msra.mxu1 %v1233_v52  ;;  %1674 = vmatpush.msra.mxu3 %v1233_v52  ;;  %v451_v63 = vadd.f32 %v419_v28, %v289_v7  ;;  %v777_v50 = vadd.f32 %v745_v62, %v2705_v35  ;;  %v875_v42 = vmul.f32 %v1932_v1, %v2696_v2  ;;  %v1068_v45 = vmax.f32 %v1036_v60, 0.0  ;;  %v1262_v1 = vld [vmem:[%s2872_s3] sm:$0xff] }
 0x168   :  { %v970_v26 = vadd.f32 %v938_v40, %v840_v10  ;;  %v679_v43 = vmax.f32 %v647_v59, 0.0  ;;  %v1005_v0 = vmul.f32 %v1936_v3, %v2696_v2  ;;  %v1198_v48 = vmax.f32 %v1166_v37, 0.0  ;;  %v1367_v59 = vpop.permute.xlu0 %1366  ;;  %v1362_v40 = vpop.permute.xlu1 %1361 }
 0x169   :  { %v581_v11 = vadd.f32 %v549_v39, %v451_v63  ;;  %v907_v25 = vadd.f32 %v875_v42, %v2705_v35  ;;  %v809_v47 = vmax.f32 %v777_v50, 0.0  ;;  %v1135_v49 = vmul.f32 %v1938_v4, %v2696_v2 }
 0x16a   :  { %v1100_v21 = vadd.f32 %v1068_v45, %v970_v26  ;;  %v1037_v14 = vadd.f32 %v1005_v0, %v2705_v35 }
 0x16b   :  { %v711_v33 = vadd.f32 %v679_v43, %v581_v11  ;;  %v939_v3 = vmax.f32 %v907_v25, 0.0  ;;  %v1167_v46 = vadd.f32 %v1135_v49, %v2705_v35  ;;  %v1264_v35 = vld [vmem:[%s2872_s3 + $0x10] sm:$0xff] }
 0x16c   :  { %v1230_v17 = vadd.f32 %v1198_v48, %v1100_v21  ;;  %v1069_v8 = vmax.f32 %v1037_v14, 0.0 }
 0x16d   :  { %v841_v6 = vadd.f32 %v809_v47, %v711_v33  ;;  %v1199_v2 = vmax.f32 %v1167_v46, 0.0 }
 0x16e   :  { %1389 = vmatpush.msra.mxu0 %v1230_v17  ;;  %1659 = vmatpush.msra.mxu2 %v1230_v17  ;;  %v1357_v63 = vpop.permute.xlu2 %1356 }
 0x16f   :  { %v971_v56 = vadd.f32 %v939_v3, %v841_v6  ;;  %1390 = vmatmul.f32.vlgmr.msra.gmra.mxu0 %v1262_v1  ;;  %1417 = vmatmul.f32.vlgmr.msra.gmra.mxu2 %v1271_v34 }
 0x170   :  { %v1352_v26 = vpop.permute.xlu0 %1351  ;;  %v1347_v11 = vpop.permute.xlu1 %1346 }
 0x171   :  { %v1101_v4 = vadd.f32 %v1069_v8, %v971_v56 }
 0x173   :  { %v1231_v15 = vadd.f32 %v1199_v2, %v1101_v4 }
 0x175   :  { %1454 = vmatpush.msra.mxu1 %v1231_v15  ;;  %1675 = vmatpush.msra.mxu3 %v1231_v15 }
 0x176   :  { %1455 = vmatmul.f32.vlgmr.msra.gmra.mxu1 %v1262_v1  ;;  %1482 = vmatmul.f32.vlgmr.msra.gmra.mxu3 %v1271_v34  ;;  %v1342_v43 = vpop.permute.xlu2 %1341 }
 0x177   :  { %1393 = vmatmul.f32.gmra.mxu0 %v1263_v51  ;;  %1420 = vmatmul.f32.gmra.mxu2 %v1272_v18 }
 0x178   :  { %v1337_v17 = vpop.permute.xlu0 %1336  ;;  %v1332_v6 = vpop.permute.xlu1 %1331 }
 0x17e   :  { %1458 = vmatmul.f32.gmra.mxu1 %v1263_v51  ;;  %1485 = vmatmul.f32.gmra.mxu3 %v1272_v18  ;;  %v1327_v8 = vpop.permute.xlu2 %1326 }
 0x17f   :  { %1396 = vmatmul.f32.gmra.mxu0 %v1264_v35  ;;  %1423 = vmatmul.f32.gmra.mxu2 %v1273_v61 }
 0x186   :  { %1461 = vmatmul.f32.gmra.mxu1 %v1264_v35  ;;  %1488 = vmatmul.f32.gmra.mxu3 %v1273_v61 }
 0x187   :  { %1399 = vmatmul.f32.gmra.mxu0 %v1265_v53  ;;  %1426 = vmatmul.f32.gmra.mxu2 %v1274_v9 }
 0x18e   :  { %1464 = vmatmul.f32.gmra.mxu1 %v1265_v53  ;;  %1491 = vmatmul.f32.gmra.mxu3 %v1274_v9 }
 0x18f   :  { %1402 = vmatmul.f32.gmra.mxu0 %v1266_v12  ;;  %1429 = vmatmul.f32.gmra.mxu2 %v1275_v54 }
 0x196   :  { %1467 = vmatmul.f32.gmra.mxu1 %v1266_v12  ;;  %1494 = vmatmul.f32.gmra.mxu3 %v1275_v54 }
 0x197   :  { %1405 = vmatmul.f32.gmra.mxu0 %v1267_v13  ;;  %1432 = vmatmul.f32.gmra.mxu2 %v1276_v31 }
 0x19e   :  { %1470 = vmatmul.f32.gmra.mxu1 %v1267_v13  ;;  %1497 = vmatmul.f32.gmra.mxu3 %v1276_v31 }
 0x19f   :  { %1408 = vmatmul.f32.gmra.mxu0 %v1268_v16  ;;  %1435 = vmatmul.f32.gmra.mxu2 %v1277_v38 }
 0x1a6   :  { %1473 = vmatmul.f32.gmra.mxu1 %v1268_v16  ;;  %1500 = vmatmul.f32.gmra.mxu3 %v1277_v38  ;;  %v1322_v38 = vpop.permute.xlu0 %1321 }
 0x1a7   :  { %1411 = vmatmul.f32.gmra.mxu0 %v1269_v5 }
 0x1ae   :  { %1476 = vmatmul.f32.gmra.mxu1 %v1269_v5 }
 0x1af   :  { %1414 = vmatmul.f32.gmra.mxu0 %v1270_v19 }
 0x1b6   :  { %1479 = vmatmul.f32.gmra.mxu1 %v1270_v19 }
 0x1ec   :  { %v2809_v41 = vpop.f32.mrf.mxu0 }
 0x1f2   :  { %v1418_v55 = vpop.f32.mrf.mxu2 }
 0x1f3   :  { %v2811_v20 = vpop.f32.mrf.mxu1  ;;  %v1419_v9 = vadd.f32 %v1418_v55, %v1342_v43 }
 0x1f4   :  { %v2813_v22 = vpop.f32.mrf.mxu0 }
 0x1f9   :  { %v2815_v23 = vpop.f32.mrf.mxu3 }
 0x1fa   :  { %v1421_v30 = vpop.f32.mrf.mxu2 }
 0x1fb   :  { %v2817_v57 = vpop.f32.mrf.mxu1  ;;  %v1422_v15 = vadd.f32 %v1421_v30, %v1347_v11  ;;  %v1522_v30 = vmax.f32 %v1419_v9, 0.0 }
 0x1fc   :  { %v2819_v27 = vpop.f32.mrf.mxu0 }
 0x1fd   :  { %v1524_v31 = vmax.f32 %v1422_v15, 0.0 }
 0x201   :  { %v2821_v29 = vpop.f32.mrf.mxu3 }
 0x202   :  { %v1424_v58 = vpop.f32.mrf.mxu2 }
 0x203   :  { %v2823_v44 = vpop.f32.mrf.mxu1  ;;  %v1425_v3 = vadd.f32 %v1424_v58, %v1352_v26 }
 0x204   :  { %v2825_v24 = vpop.f32.mrf.mxu0 }
 0x205   :  { %v1526_v12 = vmax.f32 %v1425_v3, 0.0 }
 0x209   :  { %v1489_v52 = vpop.f32.mrf.mxu3 }
 0x20a   :  { %v1427_v32 = vpop.f32.mrf.mxu2  ;;  %v1490_v5 = vadd.f32 %v1489_v52, %v1352_v26 }
 0x20b   :  { %v2827_v60 = vpop.f32.mrf.mxu1  ;;  %v1428_v1 = vadd.f32 %v1427_v32, %v1357_v63  ;;  %v1317_v32 = vpop.permute.xlu1 %1316 }
 0x20c   :  { %v2829_v7 = vpop.f32.mrf.mxu0 }
 0x20d   :  { %v1528_v51 = vmax.f32 %v1428_v1, 0.0 }
 0x211   :  { %v1492_v28 = vpop.f32.mrf.mxu3 }
 0x212   :  { %v1430_v62 = vpop.f32.mrf.mxu2  ;;  %v1493_v54 = vadd.f32 %v1492_v28, %v1357_v63  ;;  %v1484_v63 = vadd.f32 %v2815_v23, %v1342_v43  ;;  %v1307_v23 = vpop.permute.xlu0 %1306 }
 0x213   :  { %v2831_v10 = vpop.f32.mrf.mxu1  ;;  %v1431_v14 = vadd.f32 %v1430_v62, %v1362_v40 }
 0x214   :  { %v2833_v37 = vpop.f32.mrf.mxu0 }
 0x215   :  { %v1530_v46 = vmax.f32 %v1431_v14, 0.0  ;;  %v1407_v52 = vadd.f32 %v2833_v37, %v1322_v38 }
 0x219   :  { %v1495_v39 = vpop.f32.mrf.mxu3 }
 0x21a   :  { %v1433_v50 = vpop.f32.mrf.mxu2  ;;  %v1496_v35 = vadd.f32 %v1495_v39, %v1362_v40  ;;  %v1312_v40 = vpop.permute.xlu2 %1311  ;;  %v1527_v39 = vmax.f32 %v1490_v5, 0.0 }
 0x21b   :  { %v2835_v42 = vpop.f32.mrf.mxu1  ;;  %v1434_v21 = vadd.f32 %v1433_v50, %v1367_v59 }
 0x21c   :  { %v1409_v45 = vpop.f32.mrf.mxu0  ;;  %v1531_v19 = vmax.f32 %v1496_v35, 0.0 }
 0x21d   :  { %v1532_v34 = vmax.f32 %v1434_v21, 0.0  ;;  %v1410_v55 = vadd.f32 %v1409_v45, %v1327_v8  ;;  %v1523_v45 = vmax.f32 %v1484_v63, 0.0  ;;  %v1401_v21 = vadd.f32 %v2825_v24, %v1312_v40 }
 0x221   :  { %v1498_v25 = vpop.f32.mrf.mxu3 }
 0x222   :  { %v1436_v0 = vpop.f32.mrf.mxu2  ;;  %v1499_v4 = vadd.f32 %v1498_v25, %v1367_v59  ;;  %v1529_v59 = vmax.f32 %v1493_v54, 0.0  ;;  %v1297_v24 = vpop.permute.xlu2 %1296 }
 0x223   :  { %v2837_v48 = vpop.f32.mrf.mxu1  ;;  %v1437_v33 = vadd.f32 %v1436_v0, %v1372_v36 }
 0x224   :  { %v1412_v47 = vpop.f32.mrf.mxu0  ;;  %v1533_v13 = vmax.f32 %v1499_v4, 0.0  ;;  %v1475_v43 = vadd.f32 %v2837_v48, %v1327_v8  ;;  %v1392_v48 = vadd.f32 %v2809_v41, %v1297_v24  ;;  %v1463_v8 = vadd.f32 %v2823_v44, %v1307_v23 }
 0x225   :  { %v1534_v49 = vmax.f32 %v1437_v33, 0.0  ;;  %v1413_v58 = vadd.f32 %v1412_v47, %v1332_v6  ;;  %v1514_v33 = vmax.f32 %v1407_v52, 0.0  ;;  %v1398_v47 = vadd.f32 %v2819_v27, %v1307_v23 }
 0x226   :  { %v1517_v3 = vmax.f32 %v1475_v43, 0.0  ;;  %v1466_v27 = vadd.f32 %v2827_v60, %v1312_v40  ;;  %v1504_v4 = vmax.f32 %v1392_v48, 0.0  ;;  %v1457_v60 = vadd.f32 %v2811_v20, %v1297_v24 }
 0x227   :  { %1539 = vmatpush.msrb.mxu2 %v1534_v49  ;;  %v1518_v50 = vmax.f32 %v1413_v58, 0.0  ;;  %v1302_v49 = vpop.permute.xlu1 %1301  ;;  %v1509_v15 = vmax.f32 %v1463_v8, 0.0 }
 0x228   :  { %v1395_v1 = vadd.f32 %v2813_v22, %v1302_v49  ;;  %v1460_v41 = vadd.f32 %v2817_v57, %v1302_v49  ;;  %v1505_v44 = vmax.f32 %v1457_v60, 0.0 }
 0x229   :  { %v1501_v56 = vpop.f32.mrf.mxu3  ;;  %1540 = vmatpush.msrb.mxu2 %v1532_v34  ;;  %v1510_v34 = vmax.f32 %v1401_v21, 0.0 }
 0x22a   :  { %v1502_v2 = vadd.f32 %v1501_v56, %v1372_v36  ;;  %v1487_v36 = vadd.f32 %v2821_v29, %v1347_v11  ;;  %v1404_v29 = vadd.f32 %v2829_v7, %v1317_v32  ;;  %v1516_v11 = vmax.f32 %v1410_v55, 0.0 }
 0x22b   :  { %v1477_v18 = vpop.f32.mrf.mxu1  ;;  %1541 = vmatpush.msrb.mxu2 %v1530_v46  ;;  %v1472_v7 = vadd.f32 %v2835_v42, %v1322_v38  ;;  %v1508_v46 = vmax.f32 %v1398_v47, 0.0  ;;  %v1506_v42 = vmax.f32 %v1395_v1, 0.0 }
 0x22c   :  { %v1535_v61 = vmax.f32 %v1502_v2, 0.0  ;;  %v1415_v53 = vpop.f32.mrf.mxu0  ;;  %v1525_v26 = vmax.f32 %v1487_v36, 0.0  ;;  %v1478_v0 = vadd.f32 %v1477_v18, %v1332_v6  ;;  %v1512_v14 = vmax.f32 %v1404_v29, 0.0 }
 0x22d   :  { %1542 = vmatpush.msrb.mxu2 %v1528_v51  ;;  %v1416_v16 = vadd.f32 %v1415_v53, %v1337_v17  ;;  %v1469_v6 = vadd.f32 %v2831_v10, %v1317_v32  ;;  %v1515_v56 = vmax.f32 %v1472_v7, 0.0  ;;  %v1536_v10 = vld [vmem:[%s2874_s5] sm:$0x1]  ;;  %v1511_v2 = vmax.f32 %v1466_v27, 0.0  ;;  %s1716_s5 = smov [#allocation3]  }
 0x22e   :  { %1559 = vmatpush.msrb.mxu3 %v1535_v61  ;;  %v1507_v51 = vmax.f32 %v1460_v41, 0.0  ;;  %v1538_v18 = vstv %s2875_s6  ;;  %s1633_s6 = sshll.u32 %s1716_s5, 4  ;;  %s1634_s6 = int_to_ptr.vmem [resolvable:$true] %s1633_s6 }
 0x22f   :  { %1543 = vmatpush.msrb.mxu2 %v1526_v12  ;;  %v1520_v62 = vmax.f32 %v1416_v16, 0.0  ;;  %v1513_v22 = vmax.f32 %v1469_v6, 0.0 }
 0x230   :  { %1560 = vmatpush.msrb.mxu3 %v1533_v13 }
 0x231   :  { %1544 = vmatpush.msrb.mxu2 %v1524_v31 }
 0x232   :  { %1561 = vmatpush.msrb.mxu3 %v1531_v19 }
 0x233   :  { %v1480_v28 = vpop.f32.mrf.mxu1  ;;  %1545 = vmatpush.msrb.mxu2 %v1522_v30 }
 0x234   :  { %1562 = vmatpush.msrb.mxu3 %v1529_v59  ;;  %v1481_v25 = vadd.f32 %v1480_v28, %v1337_v17  ;;  %v1519_v17 = vmax.f32 %v1478_v0, 0.0 }
 0x235   :  { %1546 = vmatpush.msrb.mxu2 %v1520_v62 }
 0x236   :  { %1563 = vmatpush.msrb.mxu3 %v1527_v39  ;;  %v1521_v37 = vmax.f32 %v1481_v25, 0.0 }
 0x237   :  { %1547 = vmatpush.msrb.mxu2 %v1518_v50 }
 0x238   :  { %1564 = vmatpush.msrb.mxu3 %v1525_v26  ;;  %v1623_v26 = vlaneseq }
 0x239   :  { %1548 = vmatpush.msrb.mxu2 %v1516_v11 }
 0x23a   :  { %1565 = vmatpush.msrb.mxu3 %v1523_v45  ;;  %vm1625_vm9 = vcmp.lt.s32.totalorder %v1623_v26, 256 }
 0x23b   :  { %1549 = vmatpush.msrb.mxu2 %v1514_v33 }
 0x23c   :  { %1566 = vmatpush.msrb.mxu3 %v1521_v37 }
 0x23d   :  { %1550 = vmatpush.msrb.mxu2 %v1512_v14 }
 0x23e   :  { %1567 = vmatpush.msrb.mxu3 %v1519_v17 }
 0x23f   :  { %1551 = vmatpush.msrb.mxu2 %v1510_v34 }
 0x240   :  { %1568 = vmatpush.msrb.mxu3 %v1517_v3 }
 0x241   :  { %1552 = vmatpush.msrb.mxu2 %v1508_v46 }
 0x242   :  { %1569 = vmatpush.msrb.mxu3 %v1515_v56 }
 0x243   :  { %1553 = vmatpush.msrb.mxu2 %v1506_v42 }
 0x244   :  { %1570 = vmatpush.msrb.mxu3 %v1513_v22 }
 0x245   :  { %1554 = vmatpush.msrb.mxu2 %v1504_v4 }
 0x246   :  { %1571 = vmatpush.msrb.mxu3 %v1511_v2  ;;  %1555 = vmatmul.f32.vlgmr.msrb.gmra.mxu2 %v1536_v10 }
 0x248   :  { %1572 = vmatpush.msrb.mxu3 %v1509_v15 }
 0x24a   :  { %1573 = vmatpush.msrb.mxu3 %v1507_v51 }
 0x24c   :  { %1574 = vmatpush.msrb.mxu3 %v1505_v44 }
 0x24d   :  { %1575 = vmatmul.f32.vlgmr.msrb.gmra.mxu3 %v1536_v10 }
 0x2c9   :  { %v1556_v35 = vpop.f32.mrf.mxu2 }
 0x2ca   :  { %v1557_v57 = vadd.f32 %v1556_v35, %v1538_v18 }
 0x2cc   :  { %v1579_v61 = vsub.f32 0.0, %v1557_v57 }
 0x2ce   :  { %v1581_v53 = vmul.f32 1.442695, %v1579_v61 }
 0x2d0   :  { %v1576_v9 = vpop.f32.mrf.mxu3  ;;  %1681 = vpow2.f32 %v1581_v53 }
 0x2d1   :  { %v1577_v20 = vadd.f32 %v1576_v9, %v1538_v18 }
 0x2d3   :  { %v1580_v12 = vsub.f32 0.0, %v1577_v20 }
 0x2d5   :  { %v1583_v54 = vmul.f32 1.442695, %v1580_v12 }
 0x2d6   :  { %v1682_v13 = vpop.eup %1681 }
 0x2d7   :  { %1683 = vpow2.f32 %v1583_v54  ;;  %v1585_v31 = vadd.f32 1.0, %v1682_v13 }
 0x2d9   :  { %1685 = vrcp.f32 %v1585_v31  ;;  %vm1592_vm2 = vweird.f32 %v1585_v31  ;;  %v1598_v63 = vand.u32 2147483648, %v1585_v31  ;;  %v1596_v52 = vand.u32 2147483647, %v1585_v31 }
 0x2db   :  { %v1599_v45 = vor.u32 1.1754944e-38, %v1598_v63  ;;  %vm1597_vm8 = vcmp.eq.f32.partialorder %v1596_v52, 8.507059e+37 }
 0x2dd   :  { %v1684_v16 = vpop.eup %1683 }
 0x2de   :  { %v1586_v38 = vadd.f32 1.0, %v1684_v16 }
 0x2df   :  { %v1686_v5 = vpop.eup %1685 }
 0x2e0   :  { %1687 = vrcp.f32 %v1586_v38  ;;  %v1588_v19 = vmul.f32 %v1686_v5, %v1585_v31  ;;  %vm1593_vm0 = vweird.f32 %v1686_v5  ;;  %v1613_v55 = vand.u32 2147483648, %v1586_v38 }
 0x2e1   :  { %v1611_v40 = vand.u32 2147483647, %v1586_v38  ;;  %vm2860_vm3 = vmor %vm1592_vm2, %vm1593_vm0  ;;  %vm1607_vm4 = vweird.f32 %v1586_v38 }
 0x2e2   :  { %v1589_v30 = vsub.f32 1.0, %v1588_v19  ;;  %v1614_v25 = vor.u32 1.1754944e-38, %v1613_v55 }
 0x2e3   :  { %vm1612_vm6 = vcmp.eq.f32.partialorder %v1611_v40, 8.507059e+37 }
 0x2e4   :  { %v1590_v36 = vmul.f32 %v1686_v5, %v1589_v30 }
 0x2e6   :  { %v1688_v58 = vpop.eup %1687  ;;  %v1591_v62 = vadd.f32 %v1686_v5, %v1590_v36 }
 0x2e7   :  { %v1603_v32 = vmul.f32 %v1688_v58, %v1586_v38  ;;  %vm1608_vm1 = vweird.f32 %v1688_v58 }
 0x2e8   :  { %vm1609_vm5 = vmor %vm1607_vm4, %vm1608_vm1  ;;  %v1595_v29 = vsel %vm2860_vm3, %v1686_v5, %v1591_v62 }
 0x2e9   :  { %v1604_v59 = vsub.f32 1.0, %v1603_v32  ;;  %v1600_v33 = vsel %vm1597_vm8, %v1599_v45, %v1595_v29 }
 0x2eb   :  { %v1605_v28 = vmul.f32 %v1688_v58, %v1604_v59 }
 0x2ed   :  { %v1606_v50 = vadd.f32 %v1688_v58, %v1605_v28 }
 0x2ef   :  { %v1610_v11 = vsel %vm1609_vm5, %v1688_v58, %v1606_v50 }
 0x2f0   :  { %v1615_v0 = vsel %vm1612_vm6, %v1614_v25, %v1610_v11 }
 0x2f1   :  { %v1619_v21 = vrot.slane %v1615_v0, 7 }
 0x2f3   :  { %v1621_v23 = vsel %vm1620_vm7, %v1600_v33, %v1619_v21 }
 0x2f4   :  { %1627 = vst.msk [vmem:[#allocation3] sm:$0x3] %vm1625_vm9, %v1621_v23 }
 0x2f5   :  { %1638 = dma.vmem_to_hbm [thread:$0]  %s1634_s6, 32, %s1636_s13, [#allocation4]  }
 0x2f6   :  { %1713 = dma.done.wait [#allocation4], 32  }
 0x2f7   :  { %1714 = vsyncadd [#allocation4], 4294967264 }
 0x2f8   :  { %1643 = vsyncpa [#allocation4], 1 }

</bundles_post_ra>
